<compile_context>
chip_gen: v7x
topology: tpu7x:2x2x1
jax: 0.10.0
libtpu: 0.0.40
codegen_flags: <defaults>
</compile_context>

<pallas_src>
import math

import jax
import jax.numpy as jnp
from jax.experimental import pallas as pl
from jax.experimental.pallas import tpu as pltpu

_N_TOWER_LAYERS = 5   # Linear+BN+Dropout+ReLU blocks per tower
_N_COMB_HIDDEN = 3    # combiner Linear+BN+ReLU blocks AFTER the (split) first one
_LANE = 128
_SUBLANE = 8


def _round_up(x, m):
    return ((x + m - 1) // m) * m


# ---------------------------------------------------------------------------
# Parameter construction (PyTorch-default inits, BatchNorm folded)
# ---------------------------------------------------------------------------
def _linear_init(key, fan_in, fan_out):
    """PyTorch nn.Linear default init; weight stored transposed as (in, out)."""
    kw, kb = jax.random.split(key)
    lim = 1.0 / math.sqrt(fan_in)
    w = jax.random.uniform(kw, (fan_in, fan_out), jnp.float32, -lim, lim)
    b = jax.random.uniform(kb, (fan_out,), jnp.float32, -lim, lim)
    return w, b


def _fold_bn(w, b, gamma, beta, mean, var, eps=1e-5):
    """Fold eval-mode BatchNorm1d into the preceding Linear (w is (in, out))."""
    scale = gamma / jnp.sqrt(var + eps)
    return w * scale[None, :], (b - mean) * scale + beta


def _bn_linear(key, fan_in, fan_out):
    """Linear + default-initialized eval-mode BatchNorm1d, folded (f32)."""
    w, b = _linear_init(key, fan_in, fan_out)
    gamma = jnp.ones((fan_out,), jnp.float32)
    beta = jnp.zeros((fan_out,), jnp.float32)
    mean = jnp.zeros((fan_out,), jnp.float32)
    var = jnp.ones((fan_out,), jnp.float32)
    return _fold_bn(w, b, gamma, beta, mean, var)


def _pad2d(w, rows, cols):
    return jnp.pad(w, ((0, rows - w.shape[0]), (0, cols - w.shape[1])))


# ---------------------------------------------------------------------------
# Fused kernel: 3 MLP towers + combiner + sigmoid, everything VMEM-resident.
#   x_ref : (tile_b, 3*D) f32   -- [x1 | x2 | x3], each zero-padded to D lanes
#   w_ref : (21, D, D)    bf16  -- zero-padded weight slab (see order below)
#   b_ref : (24, D)       f32   -- rows 0..18 biases, 19 = w_last, 20 = b_last
#   o_ref : (tile_b, 1)   f32   -- Bernoulli probs
# Weight order: [0..14] tower1/2/3 layers, [15..17] combiner-first split
# blocks, [18..20] combiner hidden layers.
# ---------------------------------------------------------------------------
def _dense3_kernel(x_ref, w_ref, b_ref, o_ref):
    d = w_ref.shape[-1]
    biases = b_ref[...]                      # loaded once, (24, D) f32

    def layer(h, wi, bi):
        acc = jnp.dot(h.astype(jnp.bfloat16), w_ref[wi],
                      preferred_element_type=jnp.float32)
        return jnp.maximum(acc + biases[bi:bi + 1, :], 0.0)

    # Three towers: 5 x [Linear(+folded BN) -> ReLU]; Dropout is identity in
    # inference mode. Zero-padded weight rows/cols make padded lanes exact 0s.
    latents = []
    for t in range(3):
        h = x_ref[:, t * d:(t + 1) * d]
        for l in range(_N_TOWER_LAYERS):
            idx = t * _N_TOWER_LAYERS + l
            h = layer(h, idx, idx)
        latents.append(h)

    base = 3 * _N_TOWER_LAYERS               # 15
    # Combiner layer 1: Linear(3*latent, h2) on cat([l1,l2,l3], -1)
    # == sum of three block matmuls (avoids an in-kernel lane concatenate).
    acc = jnp.dot(latents[0].astype(jnp.bfloat16), w_ref[base + 0],
                  preferred_element_type=jnp.float32)
    acc += jnp.dot(latents[1].astype(jnp.bfloat16), w_ref[base + 1],
                   preferred_element_type=jnp.float32)
    acc += jnp.dot(latents[2].astype(jnp.bfloat16), w_ref[base + 2],
                   preferred_element_type=jnp.float32)
    h = jnp.maximum(acc + biases[base:base + 1, :], 0.0)

    # Combiner layers 2-4: Linear(+folded BN) -> ReLU.
    for l in range(_N_COMB_HIDDEN):
        h = layer(h, base + 3 + l, base + 1 + l)

    # Final Linear(h2, 1) + Sigmoid as a VPU multiply + lane reduction.
    w_last = biases[base + 4:base + 5, :]         # row 19: (1, D)
    b_last = biases[base + 5:base + 6, 0:1]       # row 20: (1, 1)
    logits = jnp.sum(h * w_last, axis=-1, keepdims=True) + b_last
    o_ref[...] = jax.nn.sigmoid(logits)


# ---------------------------------------------------------------------------
# Module
# ---------------------------------------------------------------------------
class Dense3Pallas:
    def __init__(self, in1_dim, in2_dim, in3_dim, hidden_dim1, latent_dim,
                 hidden_dim2, device=None, key=None):
        if key is None:
            key = jax.random.PRNGKey(0)
        self.in1_dim, self.in2_dim, self.in3_dim = in1_dim, in2_dim, in3_dim
        self.hidden_dim1 = hidden_dim1
        self.latent_dim = latent_dim
        self.hidden_dim2 = hidden_dim2
        self.device = device  # unused placeholder, mirrors the torch signature

        d = _round_up(max(in1_dim, in2_dim, in3_dim, hidden_dim1,
                          latent_dim, hidden_dim2), _LANE)
        self.d_pad = d

        k1, k2, k3, kc = jax.random.split(key, 4)
        weights, biases = [], []

        def add_tower(k, in_dim):
            dims = [in_dim] + [hidden_dim1] * (_N_TOWER_LAYERS - 1) + [latent_dim]
            ks = jax.random.split(k, _N_TOWER_LAYERS)
            for kk, fi, fo in zip(ks, dims[:-1], dims[1:]):
                w, b = _bn_linear(kk, fi, fo)
                weights.append(_pad2d(w, d, d))
                biases.append(jnp.pad(b, (0, d - fo)))

        add_tower(k1, in1_dim)
        add_tower(k2, in2_dim)
        add_tower(k3, in3_dim)

        kcs = jax.random.split(kc, 2 + _N_COMB_HIDDEN)
        # First combiner layer Linear(3*latent, h2) + BN, split along the
        # concatenated input dim into three (latent, h2) blocks.
        wc1, bc1 = _bn_linear(kcs[0], 3 * latent_dim, hidden_dim2)
        for t in range(3):
            weights.append(
                _pad2d(wc1[t * latent_dim:(t + 1) * latent_dim], d, d))
        biases.append(jnp.pad(bc1, (0, d - hidden_dim2)))
        for i in range(_N_COMB_HIDDEN):
            w, b = _bn_linear(kcs[1 + i], hidden_dim2, hidden_dim2)
            weights.append(_pad2d(w, d, d))
            biases.append(jnp.pad(b, (0, d - hidden_dim2)))

        # Final Linear(hidden_dim2, 1) (no BatchNorm): stored as a weight row
        # + a broadcast bias row inside the bias slab.
        w_last, b_last = _linear_init(kcs[-1], hidden_dim2, 1)
        biases.append(jnp.pad(w_last[:, 0], (0, d - hidden_dim2)))
        biases.append(jnp.full((d,), b_last[0], jnp.float32))

        w_slab_f32 = jnp.stack(weights)                    # (21, d, d) f32
        self._w_slab_f32 = w_slab_f32                      # for parity check
        self.w_slab = w_slab_f32.astype(jnp.bfloat16)      # (21, d, d) bf16

        b_slab = jnp.stack(biases)                         # (21, d) f32
        nb_pad = _round_up(b_slab.shape[0], _SUBLANE)
        self.b_slab = jnp.pad(b_slab, ((0, nb_pad - b_slab.shape[0]), (0, 0)))

    # Faithful to the reference: forward() returns None.
    def forward(self, x1, x2, x3):
        return None

    def get_q(self, x1, x2, x3):
        """x1:(B,in1) x2:(B,in2) x3:(B,in3) f32 -> Bernoulli probs (B, 1)."""
        B = x1.shape[0]
        d = self.d_pad
        tile_b = min(_round_up(B, _SUBLANE), 256)
        Bp = _round_up(B, tile_b)

        def pad_x(x, in_dim):
            return jnp.pad(x.astype(jnp.float32),
                           ((0, Bp - B), (0, d - in_dim)))

        # One packed activation operand: [x1 | x2 | x3], lane-padded to d each.
        x = jnp.concatenate([pad_x(x1, self.in1_dim),
                             pad_x(x2, self.in2_dim),
                             pad_x(x3, self.in3_dim)], axis=-1)   # (Bp, 3*d)

        nw = self.w_slab.shape[0]
        nb = self.b_slab.shape[0]
        probs = pl.pallas_call(
            _dense3_kernel,
            out_shape=jax.ShapeDtypeStruct((Bp, 1), jnp.float32),
            grid=(Bp // tile_b,),
            in_specs=[
                pl.BlockSpec((tile_b, 3 * d), lambda i: (i, 0)),
                pl.BlockSpec((nw, d, d), lambda i: (0, 0, 0)),
                pl.BlockSpec((nb, d), lambda i: (0, 0)),
            ],
            out_specs=pl.BlockSpec((tile_b, 1), lambda i: (i, 0)),
            compiler_params=pltpu.CompilerParams(
                dimension_semantics=("parallel",)),
        )(x, self.w_slab, self.b_slab)
        # TODO(synk): torch.distributions.Bernoulli wrapper has no Pallas
        # equivalent; the Bernoulli `probs` tensor is returned directly.
        return probs[:B]

    # Pure-JAX f32 reference over the same (padded) parameters, for parity.
    def _get_q_reference(self, x1, x2, x3):
        d = self.d_pad
        w, b = self._w_slab_f32, self.b_slab

        def pad_x(x, in_dim):
            return jnp.pad(x.astype(jnp.float32), ((0, 0), (0, d - in_dim)))

        xs = [pad_x(x1, self.in1_dim), pad_x(x2, self.in2_dim),
              pad_x(x3, self.in3_dim)]
        latents = []
        for t in range(3):
            h = xs[t]
            for l in range(_N_TOWER_LAYERS):
                i = t * _N_TOWER_LAYERS + l
                h = jnp.maximum(h @ w[i] + b[i:i + 1], 0.0)
            latents.append(h)
        base = 3 * _N_TOWER_LAYERS
        acc = (latents[0] @ w[base] + latents[1] @ w[base + 1]
               + latents[2] @ w[base + 2])
        h = jnp.maximum(acc + b[base:base + 1], 0.0)
        for l in range(_N_COMB_HIDDEN):
            h = jnp.maximum(h @ w[base + 3 + l] + b[base + 1 + l:base + 2 + l],
                            0.0)
        logits = (jnp.sum(h * b[base + 4:base + 5], -1, keepdims=True)
                  + b[base + 5, 0])
        return jax.nn.sigmoid(logits)


if __name__ == "__main__":
    key = jax.random.PRNGKey(0)
    kx1, kx2, kx3, kp = jax.random.split(key, 4)

    # B=16 fills one packed (16,128) bf16 vreg; dims lane/sublane friendly.
    B = 16
    in1_dim, in2_dim, in3_dim = 64, 48, 32
    hidden_dim1, latent_dim, hidden_dim2 = 128, 64, 128

    x1 = jax.random.normal(kx1, (B, in1_dim), dtype=jnp.float32)
    x2 = jax.random.normal(kx2, (B, in2_dim), dtype=jnp.float32)
    x3 = jax.random.normal(kx3, (B, in3_dim), dtype=jnp.float32)

    model = Dense3Pallas(in1_dim, in2_dim, in3_dim, hidden_dim1, latent_dim,
                         hidden_dim2, device=None, key=kp)
    assert model.forward(x1, x2, x3) is None

    probs = model.get_q(x1, x2, x3)
    probs = jax.block_until_ready(probs)

    assert probs.shape == (B, 1)
    assert bool(jnp.all((probs >= 0.0) & (probs <= 1.0)))

    # Parity vs pure-JAX f32 reference (bf16 weights -> generous tolerance).
    ref = jax.block_until_ready(model._get_q_reference(x1, x2, x3))
    assert float(jnp.max(jnp.abs(probs - ref))) < 5e-2

    print("KERNEL_OK")
</pallas_src>

<mosaic_0001>
module attributes {stable_mosaic.version = 11 : i64} {
  func.func @_dense3_kernel(%arg0: i32, %arg1: memref<16x384xf32, #tpu.memory_space<vmem>>, %arg2: memref<21x128x128xbf16, #tpu.memory_space<vmem>>, %arg3: memref<24x128xf32, #tpu.memory_space<vmem>>, %arg4: memref<16x1xf32, #tpu.memory_space<vmem>>) attributes {dimension_semantics = [#tpu.dimension_semantics<parallel>], iteration_bounds = array<i64: 1>, scalar_prefetch = 0 : i64, scratch_operands = 0 : i64, tpu.core_type = #tpu.core_type<tc>, window_params = [{transform_indices = @transform_0, window_bounds = array<i64: 16, 384>}, {pipeline_mode = #tpu.pipeline_mode<synchronous>, transform_indices = @transform_1, window_bounds = array<i64: 21, 128, 128>}, {pipeline_mode = #tpu.pipeline_mode<synchronous>, transform_indices = @transform_2, window_bounds = array<i64: 24, 128>}, {transform_indices = @transform_3, window_bounds = array<i64: 16, 1>}]} {
    %c0 = arith.constant 0 : index
    %c0_0 = arith.constant 0 : index
    %0 = vector.load %arg3[%c0, %c0_0] : memref<24x128xf32, #tpu.memory_space<vmem>>, vector<24x128xf32>
    %c0_1 = arith.constant 0 : index
    %c0_2 = arith.constant 0 : index
    %1 = vector.load %arg1[%c0_1, %c0_2] : memref<16x384xf32, #tpu.memory_space<vmem>>, vector<16x128xf32>
    %2 = arith.truncf %1 : vector<16x128xf32> to vector<16x128xbf16>
    %c0_3 = arith.constant 0 : index
    %c0_4 = arith.constant 0 : index
    %c0_5 = arith.constant 0 : index
    %3 = vector.load %arg2[%c0_3, %c0_4, %c0_5] : memref<21x128x128xbf16, #tpu.memory_space<vmem>>, vector<1x128x128xbf16>
    %4 = vector.shape_cast %3 : vector<1x128x128xbf16> to vector<128x128xbf16>
    %cst = arith.constant dense<0.000000e+00> : vector<16x128xf32>
    %5 = tpu.matmul %2, %4, %cst {dimension_numbers = #tpu.dot_dimension_numbers<[1], [0], [0], [1], [0, 0, 1, 1], [], []>} : vector<16x128xbf16>, vector<128x128xbf16>, vector<16x128xf32> -> vector<16x128xf32>
    %6 = vector.extract_strided_slice %0 {offsets = [0, 0], sizes = [1, 128], strides = [1, 1]} : vector<24x128xf32> to vector<1x128xf32>
    %7 = vector.broadcast %6 : vector<1x128xf32> to vector<16x128xf32>
    %8 = arith.addf %5, %7 : vector<16x128xf32>
    %cst_6 = arith.constant 0.000000e+00 : f32
    %9 = vector.broadcast %cst_6 : f32 to vector<16x128xf32>
    %10 = arith.maximumf %8, %9 : vector<16x128xf32>
    %11 = arith.truncf %10 : vector<16x128xf32> to vector<16x128xbf16>
    %c1 = arith.constant 1 : index
    %c0_7 = arith.constant 0 : index
    %c0_8 = arith.constant 0 : index
    %12 = vector.load %arg2[%c1, %c0_7, %c0_8] : memref<21x128x128xbf16, #tpu.memory_space<vmem>>, vector<1x128x128xbf16>
    %13 = vector.shape_cast %12 : vector<1x128x128xbf16> to vector<128x128xbf16>
    %cst_9 = arith.constant dense<0.000000e+00> : vector<16x128xf32>
    %14 = tpu.matmul %11, %13, %cst_9 {dimension_numbers = #tpu.dot_dimension_numbers<[1], [0], [0], [1], [0, 0, 1, 1], [], []>} : vector<16x128xbf16>, vector<128x128xbf16>, vector<16x128xf32> -> vector<16x128xf32>
    %15 = vector.extract_strided_slice %0 {offsets = [1, 0], sizes = [1, 128], strides = [1, 1]} : vector<24x128xf32> to vector<1x128xf32>
    %16 = vector.broadcast %15 : vector<1x128xf32> to vector<16x128xf32>
    %17 = arith.addf %14, %16 : vector<16x128xf32>
    %cst_10 = arith.constant 0.000000e+00 : f32
    %18 = vector.broadcast %cst_10 : f32 to vector<16x128xf32>
    %19 = arith.maximumf %17, %18 : vector<16x128xf32>
    %20 = arith.truncf %19 : vector<16x128xf32> to vector<16x128xbf16>
    %c2 = arith.constant 2 : index
    %c0_11 = arith.constant 0 : index
    %c0_12 = arith.constant 0 : index
    %21 = vector.load %arg2[%c2, %c0_11, %c0_12] : memref<21x128x128xbf16, #tpu.memory_space<vmem>>, vector<1x128x128xbf16>
    %22 = vector.shape_cast %21 : vector<1x128x128xbf16> to vector<128x128xbf16>
    %cst_13 = arith.constant dense<0.000000e+00> : vector<16x128xf32>
    %23 = tpu.matmul %20, %22, %cst_13 {dimension_numbers = #tpu.dot_dimension_numbers<[1], [0], [0], [1], [0, 0, 1, 1], [], []>} : vector<16x128xbf16>, vector<128x128xbf16>, vector<16x128xf32> -> vector<16x128xf32>
    %24 = vector.extract_strided_slice %0 {offsets = [2, 0], sizes = [1, 128], strides = [1, 1]} : vector<24x128xf32> to vector<1x128xf32>
    %25 = vector.broadcast %24 : vector<1x128xf32> to vector<16x128xf32>
    %26 = arith.addf %23, %25 : vector<16x128xf32>
    %cst_14 = arith.constant 0.000000e+00 : f32
    %27 = vector.broadcast %cst_14 : f32 to vector<16x128xf32>
    %28 = arith.maximumf %26, %27 : vector<16x128xf32>
    %29 = arith.truncf %28 : vector<16x128xf32> to vector<16x128xbf16>
    %c3 = arith.constant 3 : index
    %c0_15 = arith.constant 0 : index
    %c0_16 = arith.constant 0 : index
    %30 = vector.load %arg2[%c3, %c0_15, %c0_16] : memref<21x128x128xbf16, #tpu.memory_space<vmem>>, vector<1x128x128xbf16>
    %31 = vector.shape_cast %30 : vector<1x128x128xbf16> to vector<128x128xbf16>
    %cst_17 = arith.constant dense<0.000000e+00> : vector<16x128xf32>
    %32 = tpu.matmul %29, %31, %cst_17 {dimension_numbers = #tpu.dot_dimension_numbers<[1], [0], [0], [1], [0, 0, 1, 1], [], []>} : vector<16x128xbf16>, vector<128x128xbf16>, vector<16x128xf32> -> vector<16x128xf32>
    %33 = vector.extract_strided_slice %0 {offsets = [3, 0], sizes = [1, 128], strides = [1, 1]} : vector<24x128xf32> to vector<1x128xf32>
    %34 = vector.broadcast %33 : vector<1x128xf32> to vector<16x128xf32>
    %35 = arith.addf %32, %34 : vector<16x128xf32>
    %cst_18 = arith.constant 0.000000e+00 : f32
    %36 = vector.broadcast %cst_18 : f32 to vector<16x128xf32>
    %37 = arith.maximumf %35, %36 : vector<16x128xf32>
    %38 = arith.truncf %37 : vector<16x128xf32> to vector<16x128xbf16>
    %c4 = arith.constant 4 : index
    %c0_19 = arith.constant 0 : index
    %c0_20 = arith.constant 0 : index
    %39 = vector.load %arg2[%c4, %c0_19, %c0_20] : memref<21x128x128xbf16, #tpu.memory_space<vmem>>, vector<1x128x128xbf16>
    %40 = vector.shape_cast %39 : vector<1x128x128xbf16> to vector<128x128xbf16>
    %cst_21 = arith.constant dense<0.000000e+00> : vector<16x128xf32>
    %41 = tpu.matmul %38, %40, %cst_21 {dimension_numbers = #tpu.dot_dimension_numbers<[1], [0], [0], [1], [0, 0, 1, 1], [], []>} : vector<16x128xbf16>, vector<128x128xbf16>, vector<16x128xf32> -> vector<16x128xf32>
    %42 = vector.extract_strided_slice %0 {offsets = [4, 0], sizes = [1, 128], strides = [1, 1]} : vector<24x128xf32> to vector<1x128xf32>
    %43 = vector.broadcast %42 : vector<1x128xf32> to vector<16x128xf32>
    %44 = arith.addf %41, %43 : vector<16x128xf32>
    %cst_22 = arith.constant 0.000000e+00 : f32
    %45 = vector.broadcast %cst_22 : f32 to vector<16x128xf32>
    %46 = arith.maximumf %44, %45 : vector<16x128xf32>
    %c0_23 = arith.constant 0 : index
    %c128 = arith.constant 128 : index
    %47 = vector.load %arg1[%c0_23, %c128] : memref<16x384xf32, #tpu.memory_space<vmem>>, vector<16x128xf32>
    %48 = arith.truncf %47 : vector<16x128xf32> to vector<16x128xbf16>
    %c5 = arith.constant 5 : index
    %c0_24 = arith.constant 0 : index
    %c0_25 = arith.constant 0 : index
    %49 = vector.load %arg2[%c5, %c0_24, %c0_25] : memref<21x128x128xbf16, #tpu.memory_space<vmem>>, vector<1x128x128xbf16>
    %50 = vector.shape_cast %49 : vector<1x128x128xbf16> to vector<128x128xbf16>
    %cst_26 = arith.constant dense<0.000000e+00> : vector<16x128xf32>
    %51 = tpu.matmul %48, %50, %cst_26 {dimension_numbers = #tpu.dot_dimension_numbers<[1], [0], [0], [1], [0, 0, 1, 1], [], []>} : vector<16x128xbf16>, vector<128x128xbf16>, vector<16x128xf32> -> vector<16x128xf32>
    %52 = vector.extract_strided_slice %0 {offsets = [5, 0], sizes = [1, 128], strides = [1, 1]} : vector<24x128xf32> to vector<1x128xf32>
    %53 = vector.broadcast %52 : vector<1x128xf32> to vector<16x128xf32>
    %54 = arith.addf %51, %53 : vector<16x128xf32>
    %cst_27 = arith.constant 0.000000e+00 : f32
    %55 = vector.broadcast %cst_27 : f32 to vector<16x128xf32>
    %56 = arith.maximumf %54, %55 : vector<16x128xf32>
    %57 = arith.truncf %56 : vector<16x128xf32> to vector<16x128xbf16>
    %c6 = arith.constant 6 : index
    %c0_28 = arith.constant 0 : index
    %c0_29 = arith.constant 0 : index
    %58 = vector.load %arg2[%c6, %c0_28, %c0_29] : memref<21x128x128xbf16, #tpu.memory_space<vmem>>, vector<1x128x128xbf16>
    %59 = vector.shape_cast %58 : vector<1x128x128xbf16> to vector<128x128xbf16>
    %cst_30 = arith.constant dense<0.000000e+00> : vector<16x128xf32>
    %60 = tpu.matmul %57, %59, %cst_30 {dimension_numbers = #tpu.dot_dimension_numbers<[1], [0], [0], [1], [0, 0, 1, 1], [], []>} : vector<16x128xbf16>, vector<128x128xbf16>, vector<16x128xf32> -> vector<16x128xf32>
    %61 = vector.extract_strided_slice %0 {offsets = [6, 0], sizes = [1, 128], strides = [1, 1]} : vector<24x128xf32> to vector<1x128xf32>
    %62 = vector.broadcast %61 : vector<1x128xf32> to vector<16x128xf32>
    %63 = arith.addf %60, %62 : vector<16x128xf32>
    %cst_31 = arith.constant 0.000000e+00 : f32
    %64 = vector.broadcast %cst_31 : f32 to vector<16x128xf32>
    %65 = arith.maximumf %63, %64 : vector<16x128xf32>
    %66 = arith.truncf %65 : vector<16x128xf32> to vector<16x128xbf16>
    %c7 = arith.constant 7 : index
    %c0_32 = arith.constant 0 : index
    %c0_33 = arith.constant 0 : index
    %67 = vector.load %arg2[%c7, %c0_32, %c0_33] : memref<21x128x128xbf16, #tpu.memory_space<vmem>>, vector<1x128x128xbf16>
    %68 = vector.shape_cast %67 : vector<1x128x128xbf16> to vector<128x128xbf16>
    %cst_34 = arith.constant dense<0.000000e+00> : vector<16x128xf32>
    %69 = tpu.matmul %66, %68, %cst_34 {dimension_numbers = #tpu.dot_dimension_numbers<[1], [0], [0], [1], [0, 0, 1, 1], [], []>} : vector<16x128xbf16>, vector<128x128xbf16>, vector<16x128xf32> -> vector<16x128xf32>
    %70 = vector.extract_strided_slice %0 {offsets = [7, 0], sizes = [1, 128], strides = [1, 1]} : vector<24x128xf32> to vector<1x128xf32>
    %71 = vector.broadcast %70 : vector<1x128xf32> to vector<16x128xf32>
    %72 = arith.addf %69, %71 : vector<16x128xf32>
    %cst_35 = arith.constant 0.000000e+00 : f32
    %73 = vector.broadcast %cst_35 : f32 to vector<16x128xf32>
    %74 = arith.maximumf %72, %73 : vector<16x128xf32>
    %75 = arith.truncf %74 : vector<16x128xf32> to vector<16x128xbf16>
    %c8 = arith.constant 8 : index
    %c0_36 = arith.constant 0 : index
    %c0_37 = arith.constant 0 : index
    %76 = vector.load %arg2[%c8, %c0_36, %c0_37] : memref<21x128x128xbf16, #tpu.memory_space<vmem>>, vector<1x128x128xbf16>
    %77 = vector.shape_cast %76 : vector<1x128x128xbf16> to vector<128x128xbf16>
    %cst_38 = arith.constant dense<0.000000e+00> : vector<16x128xf32>
    %78 = tpu.matmul %75, %77, %cst_38 {dimension_numbers = #tpu.dot_dimension_numbers<[1], [0], [0], [1], [0, 0, 1, 1], [], []>} : vector<16x128xbf16>, vector<128x128xbf16>, vector<16x128xf32> -> vector<16x128xf32>
    %79 = vector.extract_strided_slice %0 {offsets = [8, 0], sizes = [1, 128], strides = [1, 1]} : vector<24x128xf32> to vector<1x128xf32>
    %80 = vector.broadcast %79 : vector<1x128xf32> to vector<16x128xf32>
    %81 = arith.addf %78, %80 : vector<16x128xf32>
    %cst_39 = arith.constant 0.000000e+00 : f32
    %82 = vector.broadcast %cst_39 : f32 to vector<16x128xf32>
    %83 = arith.maximumf %81, %82 : vector<16x128xf32>
    %84 = arith.truncf %83 : vector<16x128xf32> to vector<16x128xbf16>
    %c9 = arith.constant 9 : index
    %c0_40 = arith.constant 0 : index
    %c0_41 = arith.constant 0 : index
    %85 = vector.load %arg2[%c9, %c0_40, %c0_41] : memref<21x128x128xbf16, #tpu.memory_space<vmem>>, vector<1x128x128xbf16>
    %86 = vector.shape_cast %85 : vector<1x128x128xbf16> to vector<128x128xbf16>
    %cst_42 = arith.constant dense<0.000000e+00> : vector<16x128xf32>
    %87 = tpu.matmul %84, %86, %cst_42 {dimension_numbers = #tpu.dot_dimension_numbers<[1], [0], [0], [1], [0, 0, 1, 1], [], []>} : vector<16x128xbf16>, vector<128x128xbf16>, vector<16x128xf32> -> vector<16x128xf32>
    %88 = vector.extract_strided_slice %0 {offsets = [9, 0], sizes = [1, 128], strides = [1, 1]} : vector<24x128xf32> to vector<1x128xf32>
    %89 = vector.broadcast %88 : vector<1x128xf32> to vector<16x128xf32>
    %90 = arith.addf %87, %89 : vector<16x128xf32>
    %cst_43 = arith.constant 0.000000e+00 : f32
    %91 = vector.broadcast %cst_43 : f32 to vector<16x128xf32>
    %92 = arith.maximumf %90, %91 : vector<16x128xf32>
    %c0_44 = arith.constant 0 : index
    %c256 = arith.constant 256 : index
    %93 = vector.load %arg1[%c0_44, %c256] : memref<16x384xf32, #tpu.memory_space<vmem>>, vector<16x128xf32>
    %94 = arith.truncf %93 : vector<16x128xf32> to vector<16x128xbf16>
    %c10 = arith.constant 10 : index
    %c0_45 = arith.constant 0 : index
    %c0_46 = arith.constant 0 : index
    %95 = vector.load %arg2[%c10, %c0_45, %c0_46] : memref<21x128x128xbf16, #tpu.memory_space<vmem>>, vector<1x128x128xbf16>
    %96 = vector.shape_cast %95 : vector<1x128x128xbf16> to vector<128x128xbf16>
    %cst_47 = arith.constant dense<0.000000e+00> : vector<16x128xf32>
    %97 = tpu.matmul %94, %96, %cst_47 {dimension_numbers = #tpu.dot_dimension_numbers<[1], [0], [0], [1], [0, 0, 1, 1], [], []>} : vector<16x128xbf16>, vector<128x128xbf16>, vector<16x128xf32> -> vector<16x128xf32>
    %98 = vector.extract_strided_slice %0 {offsets = [10, 0], sizes = [1, 128], strides = [1, 1]} : vector<24x128xf32> to vector<1x128xf32>
    %99 = vector.broadcast %98 : vector<1x128xf32> to vector<16x128xf32>
    %100 = arith.addf %97, %99 : vector<16x128xf32>
    %cst_48 = arith.constant 0.000000e+00 : f32
    %101 = vector.broadcast %cst_48 : f32 to vector<16x128xf32>
    %102 = arith.maximumf %100, %101 : vector<16x128xf32>
    %103 = arith.truncf %102 : vector<16x128xf32> to vector<16x128xbf16>
    %c11 = arith.constant 11 : index
    %c0_49 = arith.constant 0 : index
    %c0_50 = arith.constant 0 : index
    %104 = vector.load %arg2[%c11, %c0_49, %c0_50] : memref<21x128x128xbf16, #tpu.memory_space<vmem>>, vector<1x128x128xbf16>
    %105 = vector.shape_cast %104 : vector<1x128x128xbf16> to vector<128x128xbf16>
    %cst_51 = arith.constant dense<0.000000e+00> : vector<16x128xf32>
    %106 = tpu.matmul %103, %105, %cst_51 {dimension_numbers = #tpu.dot_dimension_numbers<[1], [0], [0], [1], [0, 0, 1, 1], [], []>} : vector<16x128xbf16>, vector<128x128xbf16>, vector<16x128xf32> -> vector<16x128xf32>
    %107 = vector.extract_strided_slice %0 {offsets = [11, 0], sizes = [1, 128], strides = [1, 1]} : vector<24x128xf32> to vector<1x128xf32>
    %108 = vector.broadcast %107 : vector<1x128xf32> to vector<16x128xf32>
    %109 = arith.addf %106, %108 : vector<16x128xf32>
    %cst_52 = arith.constant 0.000000e+00 : f32
    %110 = vector.broadcast %cst_52 : f32 to vector<16x128xf32>
    %111 = arith.maximumf %109, %110 : vector<16x128xf32>
    %112 = arith.truncf %111 : vector<16x128xf32> to vector<16x128xbf16>
    %c12 = arith.constant 12 : index
    %c0_53 = arith.constant 0 : index
    %c0_54 = arith.constant 0 : index
    %113 = vector.load %arg2[%c12, %c0_53, %c0_54] : memref<21x128x128xbf16, #tpu.memory_space<vmem>>, vector<1x128x128xbf16>
    %114 = vector.shape_cast %113 : vector<1x128x128xbf16> to vector<128x128xbf16>
    %cst_55 = arith.constant dense<0.000000e+00> : vector<16x128xf32>
    %115 = tpu.matmul %112, %114, %cst_55 {dimension_numbers = #tpu.dot_dimension_numbers<[1], [0], [0], [1], [0, 0, 1, 1], [], []>} : vector<16x128xbf16>, vector<128x128xbf16>, vector<16x128xf32> -> vector<16x128xf32>
    %116 = vector.extract_strided_slice %0 {offsets = [12, 0], sizes = [1, 128], strides = [1, 1]} : vector<24x128xf32> to vector<1x128xf32>
    %117 = vector.broadcast %116 : vector<1x128xf32> to vector<16x128xf32>
    %118 = arith.addf %115, %117 : vector<16x128xf32>
    %cst_56 = arith.constant 0.000000e+00 : f32
    %119 = vector.broadcast %cst_56 : f32 to vector<16x128xf32>
    %120 = arith.maximumf %118, %119 : vector<16x128xf32>
    %121 = arith.truncf %120 : vector<16x128xf32> to vector<16x128xbf16>
    %c13 = arith.constant 13 : index
    %c0_57 = arith.constant 0 : index
    %c0_58 = arith.constant 0 : index
    %122 = vector.load %arg2[%c13, %c0_57, %c0_58] : memref<21x128x128xbf16, #tpu.memory_space<vmem>>, vector<1x128x128xbf16>
    %123 = vector.shape_cast %122 : vector<1x128x128xbf16> to vector<128x128xbf16>
    %cst_59 = arith.constant dense<0.000000e+00> : vector<16x128xf32>
    %124 = tpu.matmul %121, %123, %cst_59 {dimension_numbers = #tpu.dot_dimension_numbers<[1], [0], [0], [1], [0, 0, 1, 1], [], []>} : vector<16x128xbf16>, vector<128x128xbf16>, vector<16x128xf32> -> vector<16x128xf32>
    %125 = vector.extract_strided_slice %0 {offsets = [13, 0], sizes = [1, 128], strides = [1, 1]} : vector<24x128xf32> to vector<1x128xf32>
    %126 = vector.broadcast %125 : vector<1x128xf32> to vector<16x128xf32>
    %127 = arith.addf %124, %126 : vector<16x128xf32>
    %cst_60 = arith.constant 0.000000e+00 : f32
    %128 = vector.broadcast %cst_60 : f32 to vector<16x128xf32>
    %129 = arith.maximumf %127, %128 : vector<16x128xf32>
    %130 = arith.truncf %129 : vector<16x128xf32> to vector<16x128xbf16>
    %c14 = arith.constant 14 : index
    %c0_61 = arith.constant 0 : index
    %c0_62 = arith.constant 0 : index
    %131 = vector.load %arg2[%c14, %c0_61, %c0_62] : memref<21x128x128xbf16, #tpu.memory_space<vmem>>, vector<1x128x128xbf16>
    %132 = vector.shape_cast %131 : vector<1x128x128xbf16> to vector<128x128xbf16>
    %cst_63 = arith.constant dense<0.000000e+00> : vector<16x128xf32>
    %133 = tpu.matmul %130, %132, %cst_63 {dimension_numbers = #tpu.dot_dimension_numbers<[1], [0], [0], [1], [0, 0, 1, 1], [], []>} : vector<16x128xbf16>, vector<128x128xbf16>, vector<16x128xf32> -> vector<16x128xf32>
    %134 = vector.extract_strided_slice %0 {offsets = [14, 0], sizes = [1, 128], strides = [1, 1]} : vector<24x128xf32> to vector<1x128xf32>
    %135 = vector.broadcast %134 : vector<1x128xf32> to vector<16x128xf32>
    %136 = arith.addf %133, %135 : vector<16x128xf32>
    %cst_64 = arith.constant 0.000000e+00 : f32
    %137 = vector.broadcast %cst_64 : f32 to vector<16x128xf32>
    %138 = arith.maximumf %136, %137 : vector<16x128xf32>
    %139 = arith.truncf %46 : vector<16x128xf32> to vector<16x128xbf16>
    %c15 = arith.constant 15 : index
    %c0_65 = arith.constant 0 : index
    %c0_66 = arith.constant 0 : index
    %140 = vector.load %arg2[%c15, %c0_65, %c0_66] : memref<21x128x128xbf16, #tpu.memory_space<vmem>>, vector<1x128x128xbf16>
    %141 = vector.shape_cast %140 : vector<1x128x128xbf16> to vector<128x128xbf16>
    %cst_67 = arith.constant dense<0.000000e+00> : vector<16x128xf32>
    %142 = tpu.matmul %139, %141, %cst_67 {dimension_numbers = #tpu.dot_dimension_numbers<[1], [0], [0], [1], [0, 0, 1, 1], [], []>} : vector<16x128xbf16>, vector<128x128xbf16>, vector<16x128xf32> -> vector<16x128xf32>
    %143 = arith.truncf %92 : vector<16x128xf32> to vector<16x128xbf16>
    %c16 = arith.constant 16 : index
    %c0_68 = arith.constant 0 : index
    %c0_69 = arith.constant 0 : index
    %144 = vector.load %arg2[%c16, %c0_68, %c0_69] : memref<21x128x128xbf16, #tpu.memory_space<vmem>>, vector<1x128x128xbf16>
    %145 = vector.shape_cast %144 : vector<1x128x128xbf16> to vector<128x128xbf16>
    %cst_70 = arith.constant dense<0.000000e+00> : vector<16x128xf32>
    %146 = tpu.matmul %143, %145, %cst_70 {dimension_numbers = #tpu.dot_dimension_numbers<[1], [0], [0], [1], [0, 0, 1, 1], [], []>} : vector<16x128xbf16>, vector<128x128xbf16>, vector<16x128xf32> -> vector<16x128xf32>
    %147 = arith.addf %142, %146 : vector<16x128xf32>
    %148 = arith.truncf %138 : vector<16x128xf32> to vector<16x128xbf16>
    %c17 = arith.constant 17 : index
    %c0_71 = arith.constant 0 : index
    %c0_72 = arith.constant 0 : index
    %149 = vector.load %arg2[%c17, %c0_71, %c0_72] : memref<21x128x128xbf16, #tpu.memory_space<vmem>>, vector<1x128x128xbf16>
    %150 = vector.shape_cast %149 : vector<1x128x128xbf16> to vector<128x128xbf16>
    %cst_73 = arith.constant dense<0.000000e+00> : vector<16x128xf32>
    %151 = tpu.matmul %148, %150, %cst_73 {dimension_numbers = #tpu.dot_dimension_numbers<[1], [0], [0], [1], [0, 0, 1, 1], [], []>} : vector<16x128xbf16>, vector<128x128xbf16>, vector<16x128xf32> -> vector<16x128xf32>
    %152 = arith.addf %147, %151 : vector<16x128xf32>
    %153 = vector.extract_strided_slice %0 {offsets = [15, 0], sizes = [1, 128], strides = [1, 1]} : vector<24x128xf32> to vector<1x128xf32>
    %154 = vector.broadcast %153 : vector<1x128xf32> to vector<16x128xf32>
    %155 = arith.addf %152, %154 : vector<16x128xf32>
    %cst_74 = arith.constant 0.000000e+00 : f32
    %156 = vector.broadcast %cst_74 : f32 to vector<16x128xf32>
    %157 = arith.maximumf %155, %156 : vector<16x128xf32>
    %158 = arith.truncf %157 : vector<16x128xf32> to vector<16x128xbf16>
    %c18 = arith.constant 18 : index
    %c0_75 = arith.constant 0 : index
    %c0_76 = arith.constant 0 : index
    %159 = vector.load %arg2[%c18, %c0_75, %c0_76] : memref<21x128x128xbf16, #tpu.memory_space<vmem>>, vector<1x128x128xbf16>
    %160 = vector.shape_cast %159 : vector<1x128x128xbf16> to vector<128x128xbf16>
    %cst_77 = arith.constant dense<0.000000e+00> : vector<16x128xf32>
    %161 = tpu.matmul %158, %160, %cst_77 {dimension_numbers = #tpu.dot_dimension_numbers<[1], [0], [0], [1], [0, 0, 1, 1], [], []>} : vector<16x128xbf16>, vector<128x128xbf16>, vector<16x128xf32> -> vector<16x128xf32>
    %162 = vector.extract_strided_slice %0 {offsets = [16, 0], sizes = [1, 128], strides = [1, 1]} : vector<24x128xf32> to vector<1x128xf32>
    %163 = vector.broadcast %162 : vector<1x128xf32> to vector<16x128xf32>
    %164 = arith.addf %161, %163 : vector<16x128xf32>
    %cst_78 = arith.constant 0.000000e+00 : f32
    %165 = vector.broadcast %cst_78 : f32 to vector<16x128xf32>
    %166 = arith.maximumf %164, %165 : vector<16x128xf32>
    %167 = arith.truncf %166 : vector<16x128xf32> to vector<16x128xbf16>
    %c19 = arith.constant 19 : index
    %c0_79 = arith.constant 0 : index
    %c0_80 = arith.constant 0 : index
    %168 = vector.load %arg2[%c19, %c0_79, %c0_80] : memref<21x128x128xbf16, #tpu.memory_space<vmem>>, vector<1x128x128xbf16>
    %169 = vector.shape_cast %168 : vector<1x128x128xbf16> to vector<128x128xbf16>
    %cst_81 = arith.constant dense<0.000000e+00> : vector<16x128xf32>
    %170 = tpu.matmul %167, %169, %cst_81 {dimension_numbers = #tpu.dot_dimension_numbers<[1], [0], [0], [1], [0, 0, 1, 1], [], []>} : vector<16x128xbf16>, vector<128x128xbf16>, vector<16x128xf32> -> vector<16x128xf32>
    %171 = vector.extract_strided_slice %0 {offsets = [17, 0], sizes = [1, 128], strides = [1, 1]} : vector<24x128xf32> to vector<1x128xf32>
    %172 = vector.broadcast %171 : vector<1x128xf32> to vector<16x128xf32>
    %173 = arith.addf %170, %172 : vector<16x128xf32>
    %cst_82 = arith.constant 0.000000e+00 : f32
    %174 = vector.broadcast %cst_82 : f32 to vector<16x128xf32>
    %175 = arith.maximumf %173, %174 : vector<16x128xf32>
    %176 = arith.truncf %175 : vector<16x128xf32> to vector<16x128xbf16>
    %c20 = arith.constant 20 : index
    %c0_83 = arith.constant 0 : index
    %c0_84 = arith.constant 0 : index
    %177 = vector.load %arg2[%c20, %c0_83, %c0_84] : memref<21x128x128xbf16, #tpu.memory_space<vmem>>, vector<1x128x128xbf16>
    %178 = vector.shape_cast %177 : vector<1x128x128xbf16> to vector<128x128xbf16>
    %cst_85 = arith.constant dense<0.000000e+00> : vector<16x128xf32>
    %179 = tpu.matmul %176, %178, %cst_85 {dimension_numbers = #tpu.dot_dimension_numbers<[1], [0], [0], [1], [0, 0, 1, 1], [], []>} : vector<16x128xbf16>, vector<128x128xbf16>, vector<16x128xf32> -> vector<16x128xf32>
    %180 = vector.extract_strided_slice %0 {offsets = [18, 0], sizes = [1, 128], strides = [1, 1]} : vector<24x128xf32> to vector<1x128xf32>
    %181 = vector.broadcast %180 : vector<1x128xf32> to vector<16x128xf32>
    %182 = arith.addf %179, %181 : vector<16x128xf32>
    %cst_86 = arith.constant 0.000000e+00 : f32
    %183 = vector.broadcast %cst_86 : f32 to vector<16x128xf32>
    %184 = arith.maximumf %182, %183 : vector<16x128xf32>
    %185 = vector.extract_strided_slice %0 {offsets = [19, 0], sizes = [1, 128], strides = [1, 1]} : vector<24x128xf32> to vector<1x128xf32>
    %186 = vector.extract_strided_slice %0 {offsets = [20, 0], sizes = [1, 1], strides = [1, 1]} : vector<24x128xf32> to vector<1x1xf32>
    %187 = vector.broadcast %185 : vector<1x128xf32> to vector<16x128xf32>
    %188 = arith.mulf %184, %187 : vector<16x128xf32>
    %cst_87 = arith.constant dense<0.000000e+00> : vector<16xf32>
    %189 = vector.multi_reduction <add>, %188, %cst_87 [1] : vector<16x128xf32> to vector<16xf32>
    %190 = vector.shape_cast %189 : vector<16xf32> to vector<16x1xf32>
    %191 = vector.broadcast %186 : vector<1x1xf32> to vector<16x1xf32>
    %192 = arith.addf %190, %191 : vector<16x1xf32>
    %193 = arith.negf %192 : vector<16x1xf32>
    %194 = math.exp %193 : vector<16x1xf32>
    %cst_88 = arith.constant 1.000000e+00 : f32
    %195 = vector.broadcast %cst_88 : f32 to vector<16x1xf32>
    %196 = arith.addf %195, %194 : vector<16x1xf32>
    %197 = arith.divf %195, %196 : vector<16x1xf32>
    %c0_89 = arith.constant 0 : index
    %c0_90 = arith.constant 0 : index
    %198 = vector.load %arg4[%c0_89, %c0_90] : memref<16x1xf32, #tpu.memory_space<vmem>>, vector<16x1xf32>
    tpu.vector_store %arg4[%c0_89, %c0_90], %197 {strides = array<i32>} : memref<16x1xf32, #tpu.memory_space<vmem>>, vector<16x1xf32>,
    return
  }
  func.func @transform_0(%arg0: i32) -> (i32, i32) {
    %c0_i32 = arith.constant 0 : i32
    %c0_i32_0 = arith.constant 0 : i32
    return %arg0, %c0_i32 : i32, i32
  }
  func.func @transform_1(%arg0: i32) -> (i32, i32, i32) {
    %c0_i32 = arith.constant 0 : i32
    %c0_i32_0 = arith.constant 0 : i32
    %c0_i32_1 = arith.constant 0 : i32
    %c0_i32_2 = arith.constant 0 : i32
    return %c0_i32, %c0_i32_0, %c0_i32_1 : i32, i32, i32
  }
  func.func @transform_2(%arg0: i32) -> (i32, i32) {
    %c0_i32 = arith.constant 0 : i32
    %c0_i32_0 = arith.constant 0 : i32
    %c0_i32_1 = arith.constant 0 : i32
    return %c0_i32, %c0_i32_0 : i32, i32
  }
  func.func @transform_3(%arg0: i32) -> (i32, i32) {
    %c0_i32 = arith.constant 0 : i32
    %c0_i32_0 = arith.constant 0 : i32
    return %arg0, %c0_i32 : i32, i32
  }
}

</mosaic_0001>

<bundles_post_ra>
// kernel: tpu_custom_call.1
= control target key start
LH: loop header
LB: loop body
LE: loop exit
PB: predicated region body
PF: predicated region fallthrough
CT: control target
= control target key end

     0   :  { %8 = vsyncpa [#allocation3], 0  ;;  %s3858_s0 = inlined_call_operand.hbm [shape: f32[16,384], index: 0, kind: input, shape index: {}]   ;;  %s3859_s1 = inlined_call_operand.hbm [shape: bf16[21,128,128], index: 1, kind: input, shape index: {}]   ;;  %s3860_s2 = inlined_call_operand.hbm [shape: f32[24,128], index: 2, kind: input, shape index: {}]   ;;  %s3861_s3 = inlined_call_operand.vmem [shape: f32[16,1], index: 3, kind: output, shape index: {}]  }
   0x1   :  { %9 = vsyncpa [#allocation5], 0  ;;  %s3502_s12 = smov [#allocation4]   ;;  %s3432_s16 = scalar_lea.hbm %s3859_s1, 21504 }
   0x2   :  { %s27_s13 = sshll.u32 %s3502_s12, 4  ;;  %p3433_p0 = scmp.ne.s32.totalorder %s3859_s1, %s3432_s16  ;;  %s28_s13 = int_to_ptr.vmem [resolvable:$true] %s27_s13 }
   0x3   :  { %p3436_p1 = scmp.lt.u32.totalorder %s3432_s16, %s3859_s1 }
   0x5   :  { %p3438_p2 = pnand %p3436_p1, %p3433_p0 }
   0x7   :  { %3441 = shalt.err (!%p3438_p2)
}
   0x8   :  { %s3442_s21 = scalar_lea.vmem %s28_s13, 21504  ;;  %p3447_p4 = scmp.lt.s32.totalorder %s28_s13, %s28_s13 }
   0x9   :  { %p3443_p3 = scmp.ne.s32.totalorder %s28_s13, %s3442_s21  ;;  %p3448_p5 = scmp.lt.s32.totalorder %s3442_s21, %s3442_s21 }
   0xb   :  { %p3449_p6 = por %p3448_p5, %p3447_p4 }
   0xd   :  { %p3450_p7 = pnand %p3449_p6, %p3443_p3 }
   0xf   :  { %3453 = shalt.err (!%p3450_p7)
}
  0x10   :  { %s3503_s22 = smov 64   ;;  %s3504_s23 = smov 4  }
  0x11   :  { %33 = dma.hbm_to_vmem [thread:$0]  %s3859_s1, 21504, %s28_s13, [#allocation5], %s3503_s22, %s3503_s22, %s3504_s23  }
  0x12   :  { %s3505_s26 = smov [#allocation2]   ;;  %s3454_s30 = scalar_lea.hbm %s3858_s0, 768 }
  0x13   :  { %s15_s27 = sshll.u32 %s3505_s26, 4  ;;  %p3455_p8 = scmp.ne.s32.totalorder %s3858_s0, %s3454_s30  ;;  %s16_s27 = int_to_ptr.vmem [resolvable:$true] %s15_s27 }
  0x14   :  { %p3458_p9 = scmp.lt.u32.totalorder %s3454_s30, %s3858_s0 }
  0x16   :  { %p3460_p10 = pnand %p3458_p9, %p3455_p8 }
  0x18   :  { %3463 = shalt.err (!%p3460_p10)
}
  0x19   :  { %s3464_s8 = scalar_lea.vmem %s16_s27, 768  ;;  %p3469_p12 = scmp.lt.s32.totalorder %s16_s27, %s16_s27 }
  0x1a   :  { %p3465_p11 = scmp.ne.s32.totalorder %s16_s27, %s3464_s8  ;;  %p3470_p13 = scmp.lt.s32.totalorder %s3464_s8, %s3464_s8 }
  0x1c   :  { %p3471_p0 = por %p3470_p13, %p3469_p12 }
  0x1e   :  { %p3472_p1 = pnand %p3471_p0, %p3465_p11 }
  0x20   :  { %3475 = shalt.err (!%p3472_p1)
}
  0x21   :  { %s3506_s1 = smov 384   ;;  %s3507_s9 = smov 24  }
  0x22   :  { %21 = dma.hbm_to_vmem [thread:$0]  %s3858_s0, 768, %s16_s27, [#allocation3], %s3506_s1, %s3506_s1, %s3507_s9  }
  0x23   :  { %s3508_s12 = smov [#allocation6]   ;;  %s3476_s16 = scalar_lea.hbm %s3860_s2, 384 }
  0x24   :  { %s39_s13 = sshll.u32 %s3508_s12, 4  ;;  %p3477_p2 = scmp.ne.s32.totalorder %s3860_s2, %s3476_s16  ;;  %s40_s13 = int_to_ptr.vmem [resolvable:$true] %s39_s13 }
  0x25   :  { %p3480_p3 = scmp.lt.u32.totalorder %s3476_s16, %s3860_s2 }
  0x27   :  { %p3482_p4 = pnand %p3480_p3, %p3477_p2 }
  0x29   :  { %3485 = shalt.err (!%p3482_p4)
}
  0x2a   :  { %s3486_s21 = scalar_lea.vmem %s40_s13, 384  ;;  %p3491_p6 = scmp.lt.s32.totalorder %s40_s13, %s40_s13 }
  0x2b   :  { %p3487_p5 = scmp.ne.s32.totalorder %s40_s13, %s3486_s21  ;;  %p3492_p7 = scmp.lt.s32.totalorder %s3486_s21, %s3486_s21 }
  0x2d   :  { %p3493_p8 = por %p3492_p7, %p3491_p6 }
  0x2f   :  { %p3494_p9 = pnand %p3493_p8, %p3487_p5 }
  0x31   :  { %3497 = shalt.err (!%p3494_p9)
}
  0x32   :  { %s3509_s0 = smov 128   ;;  %s3510_s22 = smov 8  }
  0x33   :  { %45 = dma.hbm_to_vmem [thread:$0]  %s3860_s2, 384, %s40_s13, [#allocation5], %s3509_s0, %s3509_s0, %s3510_s22  }
  0x34   :  { %3498 = dma.done.wait [#allocation3], 768  }
  0x35   :  { %3499 = vsyncadd [#allocation3], 4294966528 }
  0x36   :  { %3500 = dma.done.wait [#allocation5], 21888  }
  0x37   :  { %3501 = vsyncadd [#allocation5], 4294945408  ;;  %v3511_v0 = vmov 0.0   ;;  %vm3512_vm0 = vmmov 0   ;;  %v3256_v1 = vld [vmem:[#allocation4] sm:$0xff]   ;;  %v3257_v2 = vld [vmem:[#allocation4 + $0x8] sm:$0xff]   ;;  %v78_v26 = vlaneseq }
  0x38   :  { %2825 = vmatprep.subr.bf16.mxu0 %v3511_v0  ;;  %2841 = vmatprep.mubr.msk.bf16.mxu0 %vm3512_vm0, %v3511_v0  ;;  %v3258_v3 = vld [vmem:[#allocation4 + $0x10] sm:$0xff]   ;;  %v3264_v4 = vld [vmem:[#allocation4 + $0x40] sm:$0xff]   ;;  %v3259_v5 = vld [vmem:[#allocation4 + $0x18] sm:$0xff]   ;;  %vm2457_vm1 = vcmask 7168  }
  0x39   :  { %2845 = vmatprep.subr.bf16.mxu1 %v3511_v0  ;;  %2861 = vmatprep.mubr.msk.bf16.mxu1 %vm3512_vm0, %v3511_v0  ;;  %v3265_v6 = vld [vmem:[#allocation4 + $0x48] sm:$0xff]   ;;  %v3260_v7 = vld [vmem:[#allocation4 + $0x20] sm:$0xff]   ;;  %v3266_v8 = vld [vmem:[#allocation4 + $0x50] sm:$0xff]   ;;  %v3599_v27 = vshrl.u32 %v78_v26, 7 }
  0x3a   :  { %2826 = vmatpush3.bf16.msra.mxu0 %v3256_v1  ;;  %2846 = vmatpush3.bf16.msra.mxu1 %v3264_v4  ;;  %v3261_v9 = vld [vmem:[#allocation4 + $0x28] sm:$0xff]   ;;  %v3267_v10 = vld [vmem:[#allocation4 + $0x58] sm:$0xff]   ;;  %v3262_v11 = vld [vmem:[#allocation4 + $0x30] sm:$0xff]  }
  0x3b   :  { %2827 = vmatprep.subr.bf16.mxu0 %v3511_v0  ;;  %2847 = vmatprep.subr.bf16.mxu1 %v3511_v0  ;;  %v3268_v12 = vld [vmem:[#allocation4 + $0x60] sm:$0xff]   ;;  %v3263_v13 = vld [vmem:[#allocation4 + $0x38] sm:$0xff]   ;;  %v59_v14 = vld [vmem:[#allocation2] sm:$0xff]  ;;  %v3602_v28 = vsub.s32 0, %v3599_v27  ;;  %v3619_v48 = vsub.s32 1, %v3599_v27  ;;  %v3634_v4 = vsub.s32 2, %v3599_v27 }
  0x3c   :  { %v60_v15 = vld [vmem:[#allocation2 + $0x18] sm:$0xff]  ;;  %v3270_v18 = vld [vmem:[#allocation4 + $0x70] sm:$0xff]   ;;  %v3271_v19 = vld [vmem:[#allocation4 + $0x78] sm:$0xff]  }
  0x3d   :  { %v3269_v16 = vld [vmem:[#allocation4 + $0x68] sm:$0xff]   ;;  %v61_v17 = vpack.c.bf16 %v60_v15, %v59_v14  ;;  %v3272_v20 = vld [vmem:[#allocation4 + $0x80] sm:$0xff]   ;;  %v3274_v22 = vld [vmem:[#allocation4 + $0x90] sm:$0xff]  }
  0x3e   :  { %2828 = vmatpush3.bf16.msra.mxu0 %v3257_v2  ;;  %2848 = vmatpush3.bf16.msra.mxu1 %v3265_v6  ;;  %v3273_v21 = vld [vmem:[#allocation4 + $0x88] sm:$0xff]   ;;  %v3275_v23 = vld [vmem:[#allocation4 + $0x98] sm:$0xff]   ;;  %v3276_v24 = vld [vmem:[#allocation4 + $0xa0] sm:$0xff]  }
  0x3f   :  { %2829 = vmatprep.subr.bf16.mxu0 %v3511_v0  ;;  %2849 = vmatprep.subr.bf16.mxu1 %v3511_v0  ;;  %v3277_v25 = vld [vmem:[#allocation4 + $0xa8] sm:$0xff]   ;;  %v3604_v29 = vld [vmem:[#allocation6] sm:$0xff]  ;;  %v3278_v40 = vld [vmem:[#allocation4 + $0xb0] sm:$0xff]  }
  0x40   :  { %v81_v30 = vrot.slane %v3604_v29, %v3602_v28  ;;  %v3279_v41 = vld [vmem:[#allocation4 + $0xb8] sm:$0xff]   ;;  %v3280_v42 = vld [vmem:[#allocation4 + $0xc0] sm:$0xff]   ;;  %v3281_v43 = vld [vmem:[#allocation4 + $0xc8] sm:$0xff]   ;;  %v194_v49 = vrot.slane %v3604_v29, %v3619_v48 }
  0x41   :  { %v3282_v44 = vld [vmem:[#allocation4 + $0xd0] sm:$0xff]   ;;  %v3283_v45 = vld [vmem:[#allocation4 + $0xd8] sm:$0xff]   ;;  %v3284_v46 = vld [vmem:[#allocation4 + $0xe0] sm:$0xff]  }
  0x42   :  { %2830 = vmatpush3.bf16.msra.mxu0 %v3258_v3  ;;  %2850 = vmatpush3.bf16.msra.mxu1 %v3266_v8  ;;  %v3285_v47 = vld [vmem:[#allocation4 + $0xe8] sm:$0xff]   ;;  %v3286_v59 = vld [vmem:[#allocation4 + $0xf0] sm:$0xff]   ;;  %v3287_v60 = vld [vmem:[#allocation4 + $0xf8] sm:$0xff]  }
  0x43   :  { %2831 = vmatprep.subr.bf16.mxu0 %v3511_v0  ;;  %2851 = vmatprep.subr.bf16.mxu1 %v3511_v0  ;;  %v3296_v61 = vld [vmem:[#allocation4 + $0x100] sm:$0xff]   ;;  %v3297_v62 = vld [vmem:[#allocation4 + $0x108] sm:$0xff]   ;;  %v3298_v63 = vld [vmem:[#allocation4 + $0x110] sm:$0xff]  }
  0x44   :  { %v3299_v1 = vld [vmem:[#allocation4 + $0x118] sm:$0xff]   ;;  %v3300_v2 = vld [vmem:[#allocation4 + $0x120] sm:$0xff]   ;;  %v3301_v3 = vld [vmem:[#allocation4 + $0x128] sm:$0xff]  }
  0x45   :  { %v3288_v14 = vld [vmem:[#allocation4 + $0x140] sm:$0xff]   ;;  %v3302_v26 = vld [vmem:[#allocation4 + $0x130] sm:$0xff]  }
  0x46   :  { %2832 = vmatpush3.bf16.msra.mxu0 %v3259_v5  ;;  %2852 = vmatpush3.bf16.msra.mxu1 %v3267_v10  ;;  %v307_v5 = vrot.slane %v3604_v29, %v3634_v4 }
  0x47   :  { %2833 = vmatprep.subr.bf16.mxu0 %v3511_v0  ;;  %2853 = vmatprep.subr.bf16.mxu1 %v3511_v0 }
  0x4a   :  { %2834 = vmatpush3.bf16.msra.mxu0 %v3260_v7  ;;  %2854 = vmatpush3.bf16.msra.mxu1 %v3268_v12 }
  0x4b   :  { %2835 = vmatprep.subr.bf16.mxu0 %v3511_v0  ;;  %2855 = vmatprep.subr.bf16.mxu1 %v3511_v0 }
  0x4e   :  { %2836 = vmatpush3.bf16.msra.mxu0 %v3261_v9  ;;  %2856 = vmatpush3.bf16.msra.mxu1 %v3269_v16  ;;  %v3289_v16 = vld [vmem:[#allocation4 + $0x148] sm:$0xff]  }
  0x4f   :  { %2837 = vmatprep.subr.bf16.mxu0 %v3511_v0  ;;  %2857 = vmatprep.subr.bf16.mxu1 %v3511_v0 }
  0x52   :  { %2838 = vmatpush3.bf16.msra.mxu0 %v3262_v11  ;;  %2858 = vmatpush3.bf16.msra.mxu1 %v3270_v18  ;;  %v3291_v18 = vld [vmem:[#allocation4 + $0x158] sm:$0xff]  }
  0x53   :  { %2839 = vmatprep.subr.bf16.mxu0 %v3511_v0  ;;  %2859 = vmatprep.subr.bf16.mxu1 %v3511_v0 }
  0x56   :  { %2840 = vmatpush3.bf16.msra.mxu0 %v3263_v13  ;;  %2860 = vmatpush3.bf16.msra.mxu1 %v3271_v19  ;;  %v3292_v19 = vld [vmem:[#allocation4 + $0x160] sm:$0xff]  }
  0x57   :  { %2865 = vmatprep.subr.bf16.mxu0 %v3511_v0  ;;  %2885 = vmatprep.subr.bf16.mxu1 %v3511_v0 }
  0x59   :  { %2842 = vmatmul.mubr.bf16.vlgmr.msra.gmra.mrb[0].mxu0 %v61_v17  ;;  %v3290_v17 = vld [vmem:[#allocation4 + $0x150] sm:$0xff]  }
  0x5a   :  { %2881 = vmatprep.mubr.msk.bf16.mxu0 %vm3512_vm0, %v3511_v0  ;;  %2866 = vmatpush3.bf16.msra.mxu0 %v3272_v20  ;;  %v3293_v20 = vld [vmem:[#allocation4 + $0x168] sm:$0xff]  }
  0x5b   :  { %2867 = vmatprep.subr.bf16.mxu0 %v3511_v0 }
  0x5e   :  { %2868 = vmatpush3.bf16.msra.mxu0 %v3273_v21  ;;  %v3294_v21 = vld [vmem:[#allocation4 + $0x170] sm:$0xff]  }
  0x5f   :  { %2869 = vmatprep.subr.bf16.mxu0 %v3511_v0 }
  0x62   :  { %2870 = vmatpush3.bf16.msra.mxu0 %v3274_v22  ;;  %v3295_v22 = vld [vmem:[#allocation4 + $0x178] sm:$0xff]  }
  0x63   :  { %2871 = vmatprep.subr.bf16.mxu0 %v3511_v0 }
  0x66   :  { %2872 = vmatpush3.bf16.msra.mxu0 %v3275_v23  ;;  %v625_v23 = vld [vmem:[#allocation2 + $0x8] sm:$0xff] }
  0x67   :  { %2873 = vmatprep.subr.bf16.mxu0 %v3511_v0 }
  0x6a   :  { %2874 = vmatpush3.bf16.msra.mxu0 %v3276_v24  ;;  %v626_v24 = vld [vmem:[#allocation2 + $0x20] sm:$0xff] }
  0x6b   :  { %2875 = vmatprep.subr.bf16.mxu0 %v3511_v0 }
  0x6e   :  { %2876 = vmatpush3.bf16.msra.mxu0 %v3277_v25  ;;  %v627_v25 = vpack.c.bf16 %v626_v24, %v625_v23 }
  0x6f   :  { %2877 = vmatprep.subr.bf16.mxu0 %v3511_v0 }
  0x72   :  { %2878 = vmatpush3.bf16.msra.mxu0 %v3278_v40 }
  0x73   :  { %2879 = vmatprep.subr.bf16.mxu0 %v3511_v0 }
  0x76   :  { %2880 = vmatpush3.bf16.msra.mxu0 %v3279_v41  ;;  %v3304_v41 = vld [vmem:[#allocation4 + $0x180] sm:$0xff]  }
  0x77   :  { %2905 = vmatprep.subr.bf16.mxu0 %v3511_v0 }
 0x12c   :  { %v164_v31 = vpop.f32.mrb[0].mxu0 }
 0x12d   :  { %v165_v32 = vadd.f32 %v164_v31, %v81_v30  ;;  %v2843_v33 = vpop.f32.mrb[1].mxu0  ;;  %v3653_v31 = vsub.s32 3, %v3599_v27 }
 0x12e   :  { %v167_v34 = vpop.f32.mrb[2].mxu0 }
 0x12f   :  { %v168_v35 = vadd.f32 %v167_v34, %v81_v30  ;;  %v2844_v36 = vpop.f32.mrb[3].mxu0  ;;  %v171_v37 = vmax.f32 %v165_v32, 0.0  ;;  %v3303_v30 = vld [vmem:[#allocation4 + $0x138] sm:$0xff]   ;;  %v420_v32 = vrot.slane %v3604_v29, %v3653_v31 }
 0x131   :  { %v172_v38 = vmax.f32 %v168_v35, 0.0 }
 0x133   :  { %v173_v39 = vpack.c.bf16 %v172_v38, %v171_v37 }
 0x135   :  { %2862 = vmatmul.mubr.bf16.vlgmr.msra.gmra.mrb[0].mxu1 %v173_v39 }
 0x136   :  { %2901 = vmatprep.mubr.msk.bf16.mxu1 %vm3512_vm0, %v3511_v0  ;;  %2886 = vmatpush3.bf16.msra.mxu1 %v3280_v42 }
 0x137   :  { %2887 = vmatprep.subr.bf16.mxu1 %v3511_v0 }
 0x13a   :  { %2888 = vmatpush3.bf16.msra.mxu1 %v3281_v43  ;;  %v3305_v43 = vld [vmem:[#allocation4 + $0x188] sm:$0xff]  }
 0x13b   :  { %2889 = vmatprep.subr.bf16.mxu1 %v3511_v0 }
 0x13e   :  { %2890 = vmatpush3.bf16.msra.mxu1 %v3282_v44  ;;  %v3306_v44 = vld [vmem:[#allocation4 + $0x190] sm:$0xff]  }
 0x13f   :  { %2891 = vmatprep.subr.bf16.mxu1 %v3511_v0 }
 0x142   :  { %2892 = vmatpush3.bf16.msra.mxu1 %v3283_v45  ;;  %v3307_v45 = vld [vmem:[#allocation4 + $0x198] sm:$0xff]  }
 0x143   :  { %2893 = vmatprep.subr.bf16.mxu1 %v3511_v0 }
 0x146   :  { %2894 = vmatpush3.bf16.msra.mxu1 %v3284_v46  ;;  %v3308_v46 = vld [vmem:[#allocation4 + $0x1a0] sm:$0xff]  }
 0x147   :  { %2895 = vmatprep.subr.bf16.mxu1 %v3511_v0 }
 0x14a   :  { %2896 = vmatpush3.bf16.msra.mxu1 %v3285_v47  ;;  %v647_v47 = vsub.s32 5, %v3599_v27 }
 0x14b   :  { %2897 = vmatprep.subr.bf16.mxu1 %v3511_v0 }
 0x14e   :  { %2898 = vmatpush3.bf16.msra.mxu1 %v3286_v59 }
 0x14f   :  { %2899 = vmatprep.subr.bf16.mxu1 %v3511_v0 }
 0x152   :  { %2900 = vmatpush3.bf16.msra.mxu1 %v3287_v60 }
 0x153   :  { %2925 = vmatprep.subr.bf16.mxu1 %v3511_v0 }
 0x208   :  { %v277_v50 = vpop.f32.mrb[0].mxu1 }
 0x209   :  { %v278_v51 = vadd.f32 %v277_v50, %v194_v49  ;;  %v2863_v52 = vpop.f32.mrb[1].mxu1  ;;  %v648_v50 = vrot.slane %v3604_v29, %v647_v47 }
 0x20a   :  { %v280_v53 = vpop.f32.mrb[2].mxu1 }
 0x20b   :  { %v281_v54 = vadd.f32 %v280_v53, %v194_v49  ;;  %v2864_v55 = vpop.f32.mrb[3].mxu1  ;;  %v284_v56 = vmax.f32 %v278_v51, 0.0  ;;  %v3309_v49 = vld [vmem:[#allocation4 + $0x1a8] sm:$0xff]   ;;  %v3310_v51 = vld [vmem:[#allocation4 + $0x1b0] sm:$0xff]  }
 0x20d   :  { %v285_v57 = vmax.f32 %v281_v54, 0.0 }
 0x20f   :  { %v286_v58 = vpack.c.bf16 %v285_v57, %v284_v56  ;;  %v3311_v56 = vld [vmem:[#allocation4 + $0x1b8] sm:$0xff]  }
 0x211   :  { %2882 = vmatmul.mubr.bf16.vlgmr.msra.gmra.mrb[4].mxu0 %v286_v58 }
 0x212   :  { %2921 = vmatprep.mubr.msk.bf16.mxu0 %vm3512_vm0, %v3511_v0  ;;  %2906 = vmatpush3.bf16.msra.mxu0 %v3296_v61 }
 0x213   :  { %2907 = vmatprep.subr.bf16.mxu0 %v3511_v0 }
 0x216   :  { %2908 = vmatpush3.bf16.msra.mxu0 %v3297_v62  ;;  %v3312_v62 = vld [vmem:[#allocation4 + $0x1c0] sm:$0xff]  }
 0x217   :  { %2909 = vmatprep.subr.bf16.mxu0 %v3511_v0 }
 0x21a   :  { %2910 = vmatpush3.bf16.msra.mxu0 %v3298_v63  ;;  %v3313_v63 = vld [vmem:[#allocation4 + $0x1c8] sm:$0xff]  }
 0x21b   :  { %2911 = vmatprep.subr.bf16.mxu0 %v3511_v0 }
 0x21e   :  { %2912 = vmatpush3.bf16.msra.mxu0 %v3299_v1  ;;  %v3314_v1 = vld [vmem:[#allocation4 + $0x1d0] sm:$0xff]  }
 0x21f   :  { %2913 = vmatprep.subr.bf16.mxu0 %v3511_v0 }
 0x222   :  { %2914 = vmatpush3.bf16.msra.mxu0 %v3300_v2  ;;  %v3315_v2 = vld [vmem:[#allocation4 + $0x1d8] sm:$0xff]  }
 0x223   :  { %2915 = vmatprep.subr.bf16.mxu0 %v3511_v0 }
 0x226   :  { %2916 = vmatpush3.bf16.msra.mxu0 %v3301_v3  ;;  %v3316_v3 = vld [vmem:[#allocation4 + $0x1e0] sm:$0xff]  }
 0x227   :  { %2917 = vmatprep.subr.bf16.mxu0 %v3511_v0 }
 0x22a   :  { %2918 = vmatpush3.bf16.msra.mxu0 %v3302_v26 }
 0x22b   :  { %2919 = vmatprep.subr.bf16.mxu0 %v3511_v0 }
 0x22e   :  { %2920 = vmatpush3.bf16.msra.mxu0 %v3303_v30 }
 0x22f   :  { %2945 = vmatprep.subr.bf16.mxu0 %v3511_v0 }
 0x2e4   :  { %v390_v6 = vpop.f32.mrb[4].mxu0 }
 0x2e5   :  { %v391_v7 = vadd.f32 %v390_v6, %v307_v5  ;;  %v2883_v8 = vpop.f32.mrb[5].mxu0  ;;  %v3318_v6 = vld [vmem:[#allocation4 + $0x1f0] sm:$0xff]  }
 0x2e6   :  { %v393_v9 = vpop.f32.mrb[6].mxu0  ;;  %v3320_v8 = vld [vmem:[#allocation4 + $0x200] sm:$0xff]  }
 0x2e7   :  { %v394_v10 = vadd.f32 %v393_v9, %v307_v5  ;;  %v2884_v11 = vpop.f32.mrb[7].mxu0  ;;  %v397_v12 = vmax.f32 %v391_v7, 0.0  ;;  %v3317_v5 = vld [vmem:[#allocation4 + $0x1e8] sm:$0xff]   ;;  %v3319_v7 = vld [vmem:[#allocation4 + $0x1f8] sm:$0xff]  }
 0x2e8   :  { %v3321_v9 = vld [vmem:[#allocation4 + $0x208] sm:$0xff]   ;;  %v3323_v11 = vld [vmem:[#allocation4 + $0x218] sm:$0xff]  }
 0x2e9   :  { %v398_v13 = vmax.f32 %v394_v10, 0.0  ;;  %v3322_v10 = vld [vmem:[#allocation4 + $0x210] sm:$0xff]  }
 0x2eb   :  { %v399_v15 = vpack.c.bf16 %v398_v13, %v397_v12  ;;  %v3324_v12 = vld [vmem:[#allocation4 + $0x220] sm:$0xff]   ;;  %v3325_v13 = vld [vmem:[#allocation4 + $0x228] sm:$0xff]  }
 0x2ed   :  { %2902 = vmatmul.mubr.bf16.vlgmr.msra.gmra.mrb[4].mxu1 %v399_v15 }
 0x2ee   :  { %2926 = vmatpush3.bf16.msra.mxu1 %v3288_v14  ;;  %2941 = vmatprep.mubr.msk.bf16.mxu1 %vm3512_vm0, %v3511_v0  ;;  %v3688_v14 = vsub.s32 4, %v3599_v27 }
 0x2ef   :  { %2927 = vmatprep.subr.bf16.mxu1 %v3511_v0 }
 0x2f0   :  { %v533_v15 = vrot.slane %v3604_v29, %v3688_v14 }
 0x2f2   :  { %2928 = vmatpush3.bf16.msra.mxu1 %v3289_v16 }
 0x2f3   :  { %2929 = vmatprep.subr.bf16.mxu1 %v3511_v0 }
 0x2f6   :  { %2930 = vmatpush3.bf16.msra.mxu1 %v3290_v17 }
 0x2f7   :  { %2931 = vmatprep.subr.bf16.mxu1 %v3511_v0 }
 0x2fa   :  { %2932 = vmatpush3.bf16.msra.mxu1 %v3291_v18 }
 0x2fb   :  { %2933 = vmatprep.subr.bf16.mxu1 %v3511_v0 }
 0x2fe   :  { %2934 = vmatpush3.bf16.msra.mxu1 %v3292_v19 }
 0x2ff   :  { %2935 = vmatprep.subr.bf16.mxu1 %v3511_v0 }
 0x302   :  { %2936 = vmatpush3.bf16.msra.mxu1 %v3293_v20 }
 0x303   :  { %2937 = vmatprep.subr.bf16.mxu1 %v3511_v0 }
 0x306   :  { %2938 = vmatpush3.bf16.msra.mxu1 %v3294_v21 }
 0x307   :  { %2939 = vmatprep.subr.bf16.mxu1 %v3511_v0 }
 0x30a   :  { %2940 = vmatpush3.bf16.msra.mxu1 %v3295_v22 }
 0x30b   :  { %2965 = vmatprep.subr.bf16.mxu1 %v3511_v0 }
 0x30d   :  { %2942 = vmatmul.mubr.bf16.vlgmr.msra.gmra.mrb[8].mxu1 %v627_v25  ;;  %v760_v25 = vsub.s32 6, %v3599_v27 }
 0x30e   :  { %2981 = vmatprep.mubr.msk.bf16.mxu1 %vm3512_vm0, %v3511_v0  ;;  %2966 = vmatpush3.bf16.msra.mxu1 %v3312_v62  ;;  %v3329_v62 = vld [vmem:[#allocation4 + $0x288] sm:$0xff]  }
 0x30f   :  { %2967 = vmatprep.subr.bf16.mxu1 %v3511_v0  ;;  %v761_v26 = vrot.slane %v3604_v29, %v760_v25 }
 0x312   :  { %2968 = vmatpush3.bf16.msra.mxu1 %v3313_v63  ;;  %v3331_v63 = vld [vmem:[#allocation4 + $0x298] sm:$0xff]  }
 0x313   :  { %2969 = vmatprep.subr.bf16.mxu1 %v3511_v0 }
 0x316   :  { %2970 = vmatpush3.bf16.msra.mxu1 %v3314_v1  ;;  %v3332_v1 = vld [vmem:[#allocation4 + $0x2a0] sm:$0xff]  }
 0x317   :  { %2971 = vmatprep.subr.bf16.mxu1 %v3511_v0 }
 0x31a   :  { %2972 = vmatpush3.bf16.msra.mxu1 %v3315_v2  ;;  %v3333_v2 = vld [vmem:[#allocation4 + $0x2a8] sm:$0xff]  }
 0x31b   :  { %2973 = vmatprep.subr.bf16.mxu1 %v3511_v0 }
 0x31e   :  { %2974 = vmatpush3.bf16.msra.mxu1 %v3316_v3  ;;  %v3334_v3 = vld [vmem:[#allocation4 + $0x2b0] sm:$0xff]  }
 0x31f   :  { %2975 = vmatprep.subr.bf16.mxu1 %v3511_v0 }
 0x322   :  { %2976 = vmatpush3.bf16.msra.mxu1 %v3317_v5  ;;  %v3335_v5 = vld [vmem:[#allocation4 + $0x2b8] sm:$0xff]  }
 0x323   :  { %2977 = vmatprep.subr.bf16.mxu1 %v3511_v0 }
 0x326   :  { %2978 = vmatpush3.bf16.msra.mxu1 %v3318_v6  ;;  %v1192_v6 = vld [vmem:[#allocation2 + $0x10] sm:$0xff] }
 0x327   :  { %2979 = vmatprep.subr.bf16.mxu1 %v3511_v0 }
 0x32a   :  { %2980 = vmatpush3.bf16.msra.mxu1 %v3319_v7  ;;  %v1193_v7 = vld [vmem:[#allocation2 + $0x28] sm:$0xff] }
 0x32b   :  { %3005 = vmatprep.subr.bf16.mxu1 %v3511_v0 }
 0x3c0   :  { %v503_v33 = vpop.f32.mrb[4].mxu1 }
 0x3c1   :  { %v504_v34 = vadd.f32 %v503_v33, %v420_v32  ;;  %v2903_v35 = vpop.f32.mrb[5].mxu1 }
 0x3c2   :  { %v506_v36 = vpop.f32.mrb[6].mxu1 }
 0x3c3   :  { %v507_v37 = vadd.f32 %v506_v36, %v420_v32  ;;  %v2904_v38 = vpop.f32.mrb[7].mxu1  ;;  %v510_v39 = vmax.f32 %v504_v34, 0.0 }
 0x3c5   :  { %v511_v40 = vmax.f32 %v507_v37, 0.0 }
 0x3c7   :  { %v512_v42 = vpack.c.bf16 %v511_v40, %v510_v39  ;;  %v3326_v40 = vld [vmem:[#allocation4 + $0x230] sm:$0xff]  }
 0x3c9   :  { %2922 = vmatmul.mubr.bf16.vlgmr.msra.gmra.mrb[8].mxu0 %v512_v42  ;;  %v3336_v42 = vld [vmem:[#allocation4 + $0x240] sm:$0xff]  }
 0x3ca   :  { %2946 = vmatpush3.bf16.msra.mxu0 %v3304_v41  ;;  %2961 = vmatprep.mubr.msk.bf16.mxu0 %vm3512_vm0, %v3511_v0  ;;  %v3327_v41 = vld [vmem:[#allocation4 + $0x238] sm:$0xff]  }
 0x3cb   :  { %2947 = vmatprep.subr.bf16.mxu0 %v3511_v0 }
 0x3ce   :  { %2948 = vmatpush3.bf16.msra.mxu0 %v3305_v43  ;;  %v3337_v43 = vld [vmem:[#allocation4 + $0x248] sm:$0xff]  }
 0x3cf   :  { %2949 = vmatprep.subr.bf16.mxu0 %v3511_v0 }
 0x3d2   :  { %2950 = vmatpush3.bf16.msra.mxu0 %v3306_v44  ;;  %v3338_v44 = vld [vmem:[#allocation4 + $0x250] sm:$0xff]  }
 0x3d3   :  { %2951 = vmatprep.subr.bf16.mxu0 %v3511_v0 }
 0x3d6   :  { %2952 = vmatpush3.bf16.msra.mxu0 %v3307_v45  ;;  %v3339_v45 = vld [vmem:[#allocation4 + $0x258] sm:$0xff]  }
 0x3d7   :  { %2953 = vmatprep.subr.bf16.mxu0 %v3511_v0 }
 0x3da   :  { %2954 = vmatpush3.bf16.msra.mxu0 %v3308_v46  ;;  %v3340_v46 = vld [vmem:[#allocation4 + $0x260] sm:$0xff]  }
 0x3db   :  { %2955 = vmatprep.subr.bf16.mxu0 %v3511_v0 }
 0x3de   :  { %2956 = vmatpush3.bf16.msra.mxu0 %v3309_v49  ;;  %v3341_v49 = vld [vmem:[#allocation4 + $0x268] sm:$0xff]  }
 0x3df   :  { %2957 = vmatprep.subr.bf16.mxu0 %v3511_v0 }
 0x3e0   :  { %v731_v52 = vpop.f32.mrb[8].mxu1 }
 0x3e1   :  { %v732_v53 = vadd.f32 %v731_v52, %v648_v50  ;;  %v2943_v54 = vpop.f32.mrb[9].mxu1 }
 0x3e2   :  { %v734_v55 = vpop.f32.mrb[10].mxu1  ;;  %2958 = vmatpush3.bf16.msra.mxu0 %v3310_v51 }
 0x3e3   :  { %v735_v57 = vadd.f32 %v734_v55, %v648_v50  ;;  %v2944_v58 = vpop.f32.mrb[11].mxu1  ;;  %2959 = vmatprep.subr.bf16.mxu0 %v3511_v0  ;;  %v738_v59 = vmax.f32 %v732_v53, 0.0  ;;  %v873_v50 = vsub.s32 7, %v3599_v27  ;;  %v3415_v27 = vld [vmem:[#allocation4 + $0x4f8] sm:$0xff]  }
 0x3e5   :  { %v739_v60 = vmax.f32 %v735_v57, 0.0  ;;  %v874_v51 = vrot.slane %v3604_v29, %v873_v50  ;;  %v3330_v29 = vld [vmem:[#allocation4 + $0x290] sm:$0xff]  }
 0x3e6   :  { %2960 = vmatpush3.bf16.msra.mxu0 %v3311_v56 }
 0x3e7   :  { %v740_v61 = vpack.c.bf16 %v739_v60, %v738_v59  ;;  %2985 = vmatprep.subr.bf16.mxu0 %v3511_v0  ;;  %v3328_v60 = vld [vmem:[#allocation4 + $0x280] sm:$0xff]  }
 0x3e9   :  { %2962 = vmatmul.mubr.bf16.vlgmr.msra.gmra.mrb[12].mxu0 %v740_v61 }
 0x3ea   :  { %3001 = vmatprep.mubr.msk.bf16.mxu0 %vm3512_vm0, %v3511_v0  ;;  %2986 = vmatpush3.bf16.msra.mxu0 %v3320_v8  ;;  %v1194_v8 = vpack.c.bf16 %v1193_v7, %v1192_v6 }
 0x3eb   :  { %2987 = vmatprep.subr.bf16.mxu0 %v3511_v0 }
 0x3ee   :  { %2988 = vmatpush3.bf16.msra.mxu0 %v3321_v9  ;;  %v3342_v9 = vld [vmem:[#allocation4 + $0x270] sm:$0xff]  }
 0x3ef   :  { %2989 = vmatprep.subr.bf16.mxu0 %v3511_v0 }
 0x3f2   :  { %2990 = vmatpush3.bf16.msra.mxu0 %v3322_v10  ;;  %v3343_v10 = vld [vmem:[#allocation4 + $0x278] sm:$0xff]  }
 0x3f3   :  { %2991 = vmatprep.subr.bf16.mxu0 %v3511_v0 }
 0x3f6   :  { %2992 = vmatpush3.bf16.msra.mxu0 %v3323_v11  ;;  %v3726_v11 = vld [vmem:[#allocation6 + $0x8] sm:$0xff] }
 0x3f7   :  { %2993 = vmatprep.subr.bf16.mxu0 %v3511_v0 }
 0x3fa   :  { %2994 = vmatpush3.bf16.msra.mxu0 %v3324_v12  ;;  %v987_v12 = vrot.slane %v3726_v11, %v3602_v28 }
 0x3fb   :  { %2995 = vmatprep.subr.bf16.mxu0 %v3511_v0 }
 0x3fe   :  { %2996 = vmatpush3.bf16.msra.mxu0 %v3325_v13 }
 0x3ff   :  { %2997 = vmatprep.subr.bf16.mxu0 %v3511_v0 }
 0x402   :  { %2998 = vmatpush3.bf16.msra.mxu0 %v3326_v40 }
 0x403   :  { %2999 = vmatprep.subr.bf16.mxu0 %v3511_v0 }
 0x406   :  { %3000 = vmatpush3.bf16.msra.mxu0 %v3327_v41  ;;  %v3351_v41 = vld [vmem:[#allocation4 + $0x2f8] sm:$0xff]  }
 0x407   :  { %3025 = vmatprep.subr.bf16.mxu0 %v3511_v0 }
 0x49c   :  { %v616_v16 = vpop.f32.mrb[8].mxu0 }
 0x49d   :  { %v617_v17 = vadd.f32 %v616_v16, %v533_v15  ;;  %v2923_v18 = vpop.f32.mrb[9].mxu0 }
 0x49e   :  { %v619_v19 = vpop.f32.mrb[10].mxu0 }
 0x49f   :  { %v620_v20 = vadd.f32 %v619_v19, %v533_v15  ;;  %v2924_v21 = vpop.f32.mrb[11].mxu0  ;;  %v623_v22 = vmax.f32 %v617_v17, 0.0 }
 0x4a1   :  { %v624_v23 = vmax.f32 %v620_v20, 0.0 }
 0x4a3   :  { %v3692_v24 = vpack.c.bf16 %v624_v23, %v623_v22  ;;  %v3344_v22 = vld [vmem:[#allocation4 + $0x2c0] sm:$0xff]  }
 0x4bc   :  { %v844_v30 = vpop.f32.mrb[12].mxu0 }
 0x4bd   :  { %v845_v32 = vadd.f32 %v844_v30, %v761_v26  ;;  %v2963_v33 = vpop.f32.mrb[13].mxu0  ;;  %v3346_v30 = vld [vmem:[#allocation4 + $0x2d0] sm:$0xff]  }
 0x4be   :  { %v847_v34 = vpop.f32.mrb[14].mxu0  ;;  %v3348_v33 = vld [vmem:[#allocation4 + $0x2e0] sm:$0xff]  }
 0x4bf   :  { %v848_v35 = vadd.f32 %v847_v34, %v761_v26  ;;  %v2964_v36 = vpop.f32.mrb[15].mxu0  ;;  %v851_v37 = vmax.f32 %v845_v32, 0.0  ;;  %v3345_v26 = vld [vmem:[#allocation4 + $0x2c8] sm:$0xff]   ;;  %v3347_v32 = vld [vmem:[#allocation4 + $0x2d8] sm:$0xff]  }
 0x4c0   :  { %v3349_v34 = vld [vmem:[#allocation4 + $0x2e8] sm:$0xff]   ;;  %v3350_v36 = vld [vmem:[#allocation4 + $0x2f0] sm:$0xff]  }
 0x4c1   :  { %v852_v38 = vmax.f32 %v848_v35, 0.0  ;;  %v1215_v35 = vrot.slane %v3726_v11, %v3634_v4 }
 0x4c3   :  { %v853_v39 = vpack.c.bf16 %v852_v38, %v851_v37 }
 0x4c5   :  { %2982 = vmatmul.mubr.bf16.vlgmr.msra.gmra.mrb[12].mxu1 %v853_v39 }
 0x4c6   :  { %3021 = vmatprep.mubr.msk.bf16.mxu1 %vm3512_vm0, %v3511_v0  ;;  %3006 = vmatpush3.bf16.msra.mxu1 %v3336_v42 }
 0x4c7   :  { %3007 = vmatprep.subr.bf16.mxu1 %v3511_v0 }
 0x4ca   :  { %3008 = vmatpush3.bf16.msra.mxu1 %v3337_v43 }
 0x4cb   :  { %3009 = vmatprep.subr.bf16.mxu1 %v3511_v0 }
 0x4ce   :  { %3010 = vmatpush3.bf16.msra.mxu1 %v3338_v44 }
 0x4cf   :  { %3011 = vmatprep.subr.bf16.mxu1 %v3511_v0 }
 0x4d2   :  { %3012 = vmatpush3.bf16.msra.mxu1 %v3339_v45 }
 0x4d3   :  { %3013 = vmatprep.subr.bf16.mxu1 %v3511_v0 }
 0x4d6   :  { %3014 = vmatpush3.bf16.msra.mxu1 %v3340_v46 }
 0x4d7   :  { %3015 = vmatprep.subr.bf16.mxu1 %v3511_v0 }
 0x4da   :  { %3016 = vmatpush3.bf16.msra.mxu1 %v3341_v49  ;;  %v3352_v49 = vld [vmem:[#allocation4 + $0x300] sm:$0xff]  }
 0x4db   :  { %3017 = vmatprep.subr.bf16.mxu1 %v3511_v0 }
 0x4de   :  { %3018 = vmatpush3.bf16.msra.mxu1 %v3342_v9 }
 0x4df   :  { %3019 = vmatprep.subr.bf16.mxu1 %v3511_v0 }
 0x4e2   :  { %3020 = vmatpush3.bf16.msra.mxu1 %v3343_v10 }
 0x4e3   :  { %3045 = vmatprep.subr.bf16.mxu1 %v3511_v0 }
 0x598   :  { %v957_v52 = vpop.f32.mrb[12].mxu1 }
 0x599   :  { %v958_v53 = vadd.f32 %v957_v52, %v874_v51  ;;  %v2983_v54 = vpop.f32.mrb[13].mxu1  ;;  %v3354_v52 = vld [vmem:[#allocation4 + $0x310] sm:$0xff]  }
 0x59a   :  { %v960_v55 = vpop.f32.mrb[14].mxu1  ;;  %v3356_v54 = vld [vmem:[#allocation4 + $0x320] sm:$0xff]  }
 0x59b   :  { %v961_v56 = vadd.f32 %v960_v55, %v874_v51  ;;  %v2984_v57 = vpop.f32.mrb[15].mxu1  ;;  %v964_v58 = vmax.f32 %v958_v53, 0.0  ;;  %v3353_v51 = vld [vmem:[#allocation4 + $0x308] sm:$0xff]   ;;  %v3355_v53 = vld [vmem:[#allocation4 + $0x318] sm:$0xff]  }
 0x59c   :  { %v3357_v55 = vld [vmem:[#allocation4 + $0x328] sm:$0xff]   ;;  %v3359_v57 = vld [vmem:[#allocation4 + $0x338] sm:$0xff]  }
 0x59d   :  { %v965_v59 = vmax.f32 %v961_v56, 0.0  ;;  %v3358_v56 = vld [vmem:[#allocation4 + $0x330] sm:$0xff]  }
 0x59f   :  { %v966_v61 = vpack.c.bf16 %v965_v59, %v964_v58  ;;  %v3360_v58 = vld [vmem:[#allocation4 + $0x340] sm:$0xff]   ;;  %v3361_v59 = vld [vmem:[#allocation4 + $0x348] sm:$0xff]  }
 0x5a1   :  { %3002 = vmatmul.mubr.bf16.vlgmr.msra.gmra.mrb[16].mxu0 %v966_v61  ;;  %v3363_v61 = vld [vmem:[#allocation4 + $0x358] sm:$0xff]  }
 0x5a2   :  { %3026 = vmatpush3.bf16.msra.mxu0 %v3328_v60  ;;  %3041 = vmatprep.mubr.msk.bf16.mxu0 %vm3512_vm0, %v3511_v0  ;;  %v3362_v60 = vld [vmem:[#allocation4 + $0x350] sm:$0xff]  }
 0x5a3   :  { %3027 = vmatprep.subr.bf16.mxu0 %v3511_v0 }
 0x5a6   :  { %3028 = vmatpush3.bf16.msra.mxu0 %v3329_v62  ;;  %v3364_v62 = vld [vmem:[#allocation4 + $0x360] sm:$0xff]  }
 0x5a7   :  { %3029 = vmatprep.subr.bf16.mxu0 %v3511_v0 }
 0x5aa   :  { %3030 = vmatpush3.bf16.msra.mxu0 %v3330_v29  ;;  %v3365_v29 = vld [vmem:[#allocation4 + $0x368] sm:$0xff]  }
 0x5ab   :  { %3031 = vmatprep.subr.bf16.mxu0 %v3511_v0 }
 0x5ae   :  { %3032 = vmatpush3.bf16.msra.mxu0 %v3331_v63  ;;  %v1100_v63 = vrot.slane %v3726_v11, %v3619_v48 }
 0x5af   :  { %3033 = vmatprep.subr.bf16.mxu0 %v3511_v0 }
 0x5b2   :  { %3034 = vmatpush3.bf16.msra.mxu0 %v3332_v1 }
 0x5b3   :  { %3035 = vmatprep.subr.bf16.mxu0 %v3511_v0 }
 0x5b6   :  { %3036 = vmatpush3.bf16.msra.mxu0 %v3333_v2 }
 0x5b7   :  { %3037 = vmatprep.subr.bf16.mxu0 %v3511_v0 }
 0x5ba   :  { %3038 = vmatpush3.bf16.msra.mxu0 %v3334_v3 }
 0x5bb   :  { %3039 = vmatprep.subr.bf16.mxu0 %v3511_v0 }
 0x5be   :  { %3040 = vmatpush3.bf16.msra.mxu0 %v3335_v5 }
 0x5bf   :  { %3065 = vmatprep.subr.bf16.mxu0 %v3511_v0 }
 0x5c1   :  { %3042 = vmatmul.mubr.bf16.vlgmr.msra.gmra.mrb[20].mxu0 %v1194_v8 }
 0x5c2   :  { %3081 = vmatprep.mubr.msk.bf16.mxu0 %vm3512_vm0, %v3511_v0  ;;  %3066 = vmatpush3.bf16.msra.mxu0 %v3352_v49 }
 0x5c3   :  { %3067 = vmatprep.subr.bf16.mxu0 %v3511_v0 }
 0x5c6   :  { %3068 = vmatpush3.bf16.msra.mxu0 %v3353_v51  ;;  %v3369_v51 = vld [vmem:[#allocation4 + $0x408] sm:$0xff]  }
 0x5c7   :  { %3069 = vmatprep.subr.bf16.mxu0 %v3511_v0 }
 0x5ca   :  { %3070 = vmatpush3.bf16.msra.mxu0 %v3354_v52  ;;  %v3370_v52 = vld [vmem:[#allocation4 + $0x410] sm:$0xff]  }
 0x5cb   :  { %3071 = vmatprep.subr.bf16.mxu0 %v3511_v0 }
 0x5ce   :  { %3072 = vmatpush3.bf16.msra.mxu0 %v3355_v53  ;;  %v3371_v53 = vld [vmem:[#allocation4 + $0x418] sm:$0xff]  }
 0x5cf   :  { %3073 = vmatprep.subr.bf16.mxu0 %v3511_v0 }
 0x5d2   :  { %3074 = vmatpush3.bf16.msra.mxu0 %v3356_v54  ;;  %v3372_v54 = vld [vmem:[#allocation4 + $0x420] sm:$0xff]  }
 0x5d3   :  { %3075 = vmatprep.subr.bf16.mxu0 %v3511_v0 }
 0x5d6   :  { %3076 = vmatpush3.bf16.msra.mxu0 %v3357_v55  ;;  %v3373_v55 = vld [vmem:[#allocation4 + $0x428] sm:$0xff]  }
 0x5d7   :  { %3077 = vmatprep.subr.bf16.mxu0 %v3511_v0 }
 0x5da   :  { %3078 = vmatpush3.bf16.msra.mxu0 %v3358_v56  ;;  %v3374_v56 = vld [vmem:[#allocation4 + $0x430] sm:$0xff]  }
 0x5db   :  { %3079 = vmatprep.subr.bf16.mxu0 %v3511_v0 }
 0x5de   :  { %3080 = vmatpush3.bf16.msra.mxu0 %v3359_v57  ;;  %v3375_v57 = vld [vmem:[#allocation4 + $0x438] sm:$0xff]  }
 0x5df   :  { %3105 = vmatprep.subr.bf16.mxu0 %v3511_v0 }
 0x674   :  { %v1070_v13 = vpop.f32.mrb[16].mxu0 }
 0x675   :  { %v1071_v15 = vadd.f32 %v1070_v13, %v987_v12  ;;  %v3003_v16 = vpop.f32.mrb[17].mxu0 }
 0x676   :  { %v1073_v17 = vpop.f32.mrb[18].mxu0 }
 0x677   :  { %v1074_v18 = vadd.f32 %v1073_v17, %v987_v12  ;;  %v3004_v19 = vpop.f32.mrb[19].mxu0  ;;  %v1077_v20 = vmax.f32 %v1071_v15, 0.0  ;;  %v1328_v12 = vrot.slane %v3726_v11, %v3653_v31 }
 0x679   :  { %v1078_v21 = vmax.f32 %v1074_v18, 0.0 }
 0x67b   :  { %v1079_v23 = vpack.c.bf16 %v1078_v21, %v1077_v20 }
 0x67d   :  { %3022 = vmatmul.mubr.bf16.vlgmr.msra.gmra.mrb[16].mxu1 %v1079_v23  ;;  %v3366_v23 = vld [vmem:[#allocation4 + $0x370] sm:$0xff]  }
 0x67e   :  { %3046 = vmatpush3.bf16.msra.mxu1 %v3344_v22  ;;  %3061 = vmatprep.mubr.msk.bf16.mxu1 %vm3512_vm0, %v3511_v0 }
 0x67f   :  { %3047 = vmatprep.subr.bf16.mxu1 %v3511_v0 }
 0x682   :  { %3048 = vmatpush3.bf16.msra.mxu1 %v3345_v26  ;;  %v3367_v26 = vld [vmem:[#allocation4 + $0x378] sm:$0xff]  }
 0x683   :  { %3049 = vmatprep.subr.bf16.mxu1 %v3511_v0 }
 0x686   :  { %3050 = vmatpush3.bf16.msra.mxu1 %v3346_v30  ;;  %v3376_v30 = vld [vmem:[#allocation4 + $0x380] sm:$0xff]  }
 0x687   :  { %3051 = vmatprep.subr.bf16.mxu1 %v3511_v0 }
 0x68a   :  { %3052 = vmatpush3.bf16.msra.mxu1 %v3347_v32  ;;  %v3377_v32 = vld [vmem:[#allocation4 + $0x388] sm:$0xff]  }
 0x68b   :  { %3053 = vmatprep.subr.bf16.mxu1 %v3511_v0 }
 0x68e   :  { %3054 = vmatpush3.bf16.msra.mxu1 %v3348_v33  ;;  %v3378_v33 = vld [vmem:[#allocation4 + $0x390] sm:$0xff]  }
 0x68f   :  { %3055 = vmatprep.subr.bf16.mxu1 %v3511_v0 }
 0x692   :  { %3056 = vmatpush3.bf16.msra.mxu1 %v3349_v34  ;;  %v3379_v34 = vld [vmem:[#allocation4 + $0x398] sm:$0xff]  }
 0x693   :  { %3057 = vmatprep.subr.bf16.mxu1 %v3511_v0 }
 0x694   :  { %v1298_v37 = vpop.f32.mrb[20].mxu0 }
 0x695   :  { %v1299_v38 = vadd.f32 %v1298_v37, %v1215_v35  ;;  %v3043_v39 = vpop.f32.mrb[21].mxu0  ;;  %v1441_v37 = vrot.slane %v3726_v11, %v3688_v14 }
 0x696   :  { %v1301_v40 = vpop.f32.mrb[22].mxu0  ;;  %3058 = vmatpush3.bf16.msra.mxu1 %v3350_v36  ;;  %v3381_v36 = vld [vmem:[#allocation4 + $0x3a8] sm:$0xff]  }
 0x697   :  { %v1302_v42 = vadd.f32 %v1301_v40, %v1215_v35  ;;  %v3044_v43 = vpop.f32.mrb[23].mxu0  ;;  %3059 = vmatprep.subr.bf16.mxu1 %v3511_v0  ;;  %v1305_v44 = vmax.f32 %v1299_v38, 0.0  ;;  %v3380_v35 = vld [vmem:[#allocation4 + $0x3a0] sm:$0xff]  }
 0x699   :  { %v1306_v45 = vmax.f32 %v1302_v42, 0.0 }
 0x69a   :  { %3060 = vmatpush3.bf16.msra.mxu1 %v3351_v41 }
 0x69b   :  { %v1307_v46 = vpack.c.bf16 %v1306_v45, %v1305_v44  ;;  %3085 = vmatprep.subr.bf16.mxu1 %v3511_v0 }
 0x69d   :  { %3062 = vmatmul.mubr.bf16.vlgmr.msra.gmra.mrb[20].mxu1 %v1307_v46  ;;  %v3368_v46 = vld [vmem:[#allocation4 + $0x400] sm:$0xff]  }
 0x69e   :  { %3101 = vmatprep.mubr.msk.bf16.mxu1 %vm3512_vm0, %v3511_v0  ;;  %3086 = vmatpush3.bf16.msra.mxu1 %v3360_v58  ;;  %v3382_v58 = vld [vmem:[#allocation4 + $0x3b0] sm:$0xff]  }
 0x69f   :  { %3087 = vmatprep.subr.bf16.mxu1 %v3511_v0 }
 0x6a2   :  { %3088 = vmatpush3.bf16.msra.mxu1 %v3361_v59  ;;  %v3383_v59 = vld [vmem:[#allocation4 + $0x3b8] sm:$0xff]  }
 0x6a3   :  { %3089 = vmatprep.subr.bf16.mxu1 %v3511_v0 }
 0x6a6   :  { %3090 = vmatpush3.bf16.msra.mxu1 %v3362_v60  ;;  %v3392_v60 = vld [vmem:[#allocation4 + $0x440] sm:$0xff]  }
 0x6a7   :  { %3091 = vmatprep.subr.bf16.mxu1 %v3511_v0 }
 0x6aa   :  { %3092 = vmatpush3.bf16.msra.mxu1 %v3363_v61  ;;  %v3393_v61 = vld [vmem:[#allocation4 + $0x448] sm:$0xff]  }
 0x6ab   :  { %3093 = vmatprep.subr.bf16.mxu1 %v3511_v0 }
 0x6ae   :  { %3094 = vmatpush3.bf16.msra.mxu1 %v3364_v62  ;;  %v3394_v62 = vld [vmem:[#allocation4 + $0x450] sm:$0xff]  }
 0x6af   :  { %3095 = vmatprep.subr.bf16.mxu1 %v3511_v0 }
 0x6b2   :  { %3096 = vmatpush3.bf16.msra.mxu1 %v3365_v29  ;;  %v3395_v29 = vld [vmem:[#allocation4 + $0x458] sm:$0xff]  }
 0x6b3   :  { %3097 = vmatprep.subr.bf16.mxu1 %v3511_v0 }
 0x6b6   :  { %3098 = vmatpush3.bf16.msra.mxu1 %v3366_v23 }
 0x6b7   :  { %3099 = vmatprep.subr.bf16.mxu1 %v3511_v0 }
 0x6ba   :  { %3100 = vmatpush3.bf16.msra.mxu1 %v3367_v26  ;;  %v3391_v26 = vld [vmem:[#allocation4 + $0x3f8] sm:$0xff]  }
 0x6bb   :  { %3125 = vmatprep.subr.bf16.mxu1 %v3511_v0 }
 0x750   :  { %v1183_v1 = vpop.f32.mrb[16].mxu1 }
 0x751   :  { %v1184_v2 = vadd.f32 %v1183_v1, %v1100_v63  ;;  %v3023_v3 = vpop.f32.mrb[17].mxu1  ;;  %v3397_v1 = vld [vmem:[#allocation4 + $0x468] sm:$0xff]  }
 0x752   :  { %v1186_v5 = vpop.f32.mrb[18].mxu1 }
 0x753   :  { %v1187_v6 = vadd.f32 %v1186_v5, %v1100_v63  ;;  %v3024_v7 = vpop.f32.mrb[19].mxu1  ;;  %v1190_v8 = vmax.f32 %v1184_v2, 0.0  ;;  %v3396_v63 = vld [vmem:[#allocation4 + $0x460] sm:$0xff]   ;;  %v1554_v2 = vrot.slane %v3726_v11, %v647_v47  ;;  %v3386_v47 = vld [vmem:[#allocation4 + $0x3d0] sm:$0xff]  }
 0x755   :  { %v1191_v9 = vmax.f32 %v1187_v6, 0.0 }
 0x757   :  { %v3760_v10 = vpack.c.bf16 %v1191_v9, %v1190_v8 }
 0x770   :  { %v1411_v13 = vpop.f32.mrb[20].mxu1 }
 0x771   :  { %v1412_v15 = vadd.f32 %v1411_v13, %v1328_v12  ;;  %v3063_v16 = vpop.f32.mrb[21].mxu1  ;;  %v3384_v13 = vld [vmem:[#allocation4 + $0x3c0] sm:$0xff]  }
 0x772   :  { %v1414_v17 = vpop.f32.mrb[22].mxu1  ;;  %v3385_v16 = vld [vmem:[#allocation4 + $0x3c8] sm:$0xff]  }
 0x773   :  { %v1415_v18 = vadd.f32 %v1414_v17, %v1328_v12  ;;  %v3064_v19 = vpop.f32.mrb[23].mxu1  ;;  %v1418_v20 = vmax.f32 %v1412_v15, 0.0  ;;  %v3387_v17 = vld [vmem:[#allocation4 + $0x3d8] sm:$0xff]  }
 0x774   :  { %v3389_v19 = vld [vmem:[#allocation4 + $0x3e8] sm:$0xff]  }
 0x775   :  { %v1419_v21 = vmax.f32 %v1415_v18, 0.0  ;;  %v3388_v18 = vld [vmem:[#allocation4 + $0x3e0] sm:$0xff]  }
 0x777   :  { %v1420_v22 = vpack.c.bf16 %v1419_v21, %v1418_v20  ;;  %v3390_v20 = vld [vmem:[#allocation4 + $0x3f0] sm:$0xff]  }
 0x779   :  { %3082 = vmatmul.mubr.bf16.vlgmr.msra.gmra.mrb[24].mxu0 %v1420_v22 }
 0x77a   :  { %3121 = vmatprep.mubr.msk.bf16.mxu0 %vm3512_vm0, %v3511_v0  ;;  %3106 = vmatpush3.bf16.msra.mxu0 %v3376_v30 }
 0x77b   :  { %3107 = vmatprep.subr.bf16.mxu0 %v3511_v0 }
 0x77e   :  { %3108 = vmatpush3.bf16.msra.mxu0 %v3377_v32  ;;  %v3398_v32 = vld [vmem:[#allocation4 + $0x470] sm:$0xff]  }
 0x77f   :  { %3109 = vmatprep.subr.bf16.mxu0 %v3511_v0 }
 0x782   :  { %3110 = vmatpush3.bf16.msra.mxu0 %v3378_v33  ;;  %v3399_v33 = vld [vmem:[#allocation4 + $0x478] sm:$0xff]  }
 0x783   :  { %3111 = vmatprep.subr.bf16.mxu0 %v3511_v0 }
 0x786   :  { %3112 = vmatpush3.bf16.msra.mxu0 %v3379_v34  ;;  %v3400_v34 = vld [vmem:[#allocation4 + $0x480] sm:$0xff]  }
 0x787   :  { %3113 = vmatprep.subr.bf16.mxu0 %v3511_v0 }
 0x78a   :  { %3114 = vmatpush3.bf16.msra.mxu0 %v3380_v35  ;;  %v3401_v35 = vld [vmem:[#allocation4 + $0x488] sm:$0xff]  }
 0x78b   :  { %3115 = vmatprep.subr.bf16.mxu0 %v3511_v0 }
 0x78e   :  { %3116 = vmatpush3.bf16.msra.mxu0 %v3381_v36  ;;  %v3402_v36 = vld [vmem:[#allocation4 + $0x490] sm:$0xff]  }
 0x78f   :  { %3117 = vmatprep.subr.bf16.mxu0 %v3511_v0 }
 0x792   :  { %3118 = vmatpush3.bf16.msra.mxu0 %v3382_v58  ;;  %v3407_v58 = vld [vmem:[#allocation4 + $0x4b8] sm:$0xff]  }
 0x793   :  { %3119 = vmatprep.subr.bf16.mxu0 %v3511_v0 }
 0x796   :  { %3120 = vmatpush3.bf16.msra.mxu0 %v3383_v59  ;;  %v3408_v59 = vld [vmem:[#allocation4 + $0x4c0] sm:$0xff]  }
 0x797   :  { %3145 = vmatprep.subr.bf16.mxu0 %v3511_v0 }
 0x84c   :  { %v1524_v38 = vpop.f32.mrb[24].mxu0 }
 0x84d   :  { %v1525_v39 = vadd.f32 %v1524_v38, %v1441_v37  ;;  %v3083_v40 = vpop.f32.mrb[25].mxu0  ;;  %v1667_v38 = vrot.slane %v3726_v11, %v760_v25  ;;  %v3405_v25 = vld [vmem:[#allocation4 + $0x4a8] sm:$0xff]  }
 0x84e   :  { %v1527_v41 = vpop.f32.mrb[26].mxu0 }
 0x84f   :  { %v1528_v42 = vadd.f32 %v1527_v41, %v1441_v37  ;;  %v3084_v43 = vpop.f32.mrb[27].mxu0  ;;  %v1531_v44 = vmax.f32 %v1525_v39, 0.0  ;;  %v3404_v37 = vld [vmem:[#allocation4 + $0x4a0] sm:$0xff]  }
 0x851   :  { %v1532_v45 = vmax.f32 %v1528_v42, 0.0 }
 0x853   :  { %v1533_v49 = vpack.c.bf16 %v1532_v45, %v1531_v44 }
 0x855   :  { %3102 = vmatmul.mubr.bf16.vlgmr.msra.gmra.mrb[24].mxu1 %v1533_v49 }
 0x856   :  { %3126 = vmatpush3.bf16.msra.mxu1 %v3368_v46  ;;  %3141 = vmatprep.mubr.msk.bf16.mxu1 %vm3512_vm0, %v3511_v0 }
 0x857   :  { %3127 = vmatprep.subr.bf16.mxu1 %v3511_v0 }
 0x85a   :  { %3128 = vmatpush3.bf16.msra.mxu1 %v3369_v51 }
 0x85b   :  { %3129 = vmatprep.subr.bf16.mxu1 %v3511_v0 }
 0x85e   :  { %3130 = vmatpush3.bf16.msra.mxu1 %v3370_v52 }
 0x85f   :  { %3131 = vmatprep.subr.bf16.mxu1 %v3511_v0 }
 0x862   :  { %3132 = vmatpush3.bf16.msra.mxu1 %v3371_v53 }
 0x863   :  { %3133 = vmatprep.subr.bf16.mxu1 %v3511_v0 }
 0x866   :  { %3134 = vmatpush3.bf16.msra.mxu1 %v3372_v54 }
 0x867   :  { %3135 = vmatprep.subr.bf16.mxu1 %v3511_v0 }
 0x86a   :  { %3136 = vmatpush3.bf16.msra.mxu1 %v3373_v55 }
 0x86b   :  { %3137 = vmatprep.subr.bf16.mxu1 %v3511_v0 }
 0x86e   :  { %3138 = vmatpush3.bf16.msra.mxu1 %v3374_v56 }
 0x86f   :  { %3139 = vmatprep.subr.bf16.mxu1 %v3511_v0 }
 0x872   :  { %3140 = vmatpush3.bf16.msra.mxu1 %v3375_v57  ;;  %v3406_v57 = vld [vmem:[#allocation4 + $0x4b0] sm:$0xff]  }
 0x873   :  { %3165 = vmatprep.subr.bf16.mxu1 %v3511_v0 }
 0x875   :  { %3142 = vmatmul.mubr.bf16.vlgmr.msra.gmra.mrb[28].mxu1 %v3760_v10 }
 0x876   :  { %3181 = vmatprep.mubr.msk.bf16.mxu1 %vm3512_vm0, %v3511_v0  ;;  %3166 = vmatpush3.bf16.msra.mxu1 %v3392_v60  ;;  %v3409_v60 = vld [vmem:[#allocation4 + $0x4c8] sm:$0xff]  }
 0x877   :  { %3167 = vmatprep.subr.bf16.mxu1 %v3511_v0 }
 0x87a   :  { %3168 = vmatpush3.bf16.msra.mxu1 %v3393_v61  ;;  %v3410_v61 = vld [vmem:[#allocation4 + $0x4d0] sm:$0xff]  }
 0x87b   :  { %3169 = vmatprep.subr.bf16.mxu1 %v3511_v0 }
 0x87e   :  { %3170 = vmatpush3.bf16.msra.mxu1 %v3394_v62  ;;  %v3411_v62 = vld [vmem:[#allocation4 + $0x4d8] sm:$0xff]  }
 0x87f   :  { %3171 = vmatprep.subr.bf16.mxu1 %v3511_v0 }
 0x882   :  { %3172 = vmatpush3.bf16.msra.mxu1 %v3395_v29  ;;  %v3412_v29 = vld [vmem:[#allocation4 + $0x4e0] sm:$0xff]  }
 0x883   :  { %3173 = vmatprep.subr.bf16.mxu1 %v3511_v0 }
 0x886   :  { %3174 = vmatpush3.bf16.msra.mxu1 %v3396_v63  ;;  %v3413_v63 = vld [vmem:[#allocation4 + $0x4e8] sm:$0xff]  }
 0x887   :  { %3175 = vmatprep.subr.bf16.mxu1 %v3511_v0 }
 0x88a   :  { %3176 = vmatpush3.bf16.msra.mxu1 %v3397_v1  ;;  %v2085_v1 = vrot.slane %v3726_v11, %v873_v50  ;;  %v3416_v50 = vld [vmem:[#allocation4 + $0x500] sm:$0xff]   ;;  %v3417_v11 = vld [vmem:[#allocation4 + $0x508] sm:$0xff]  }
 0x88b   :  { %3177 = vmatprep.subr.bf16.mxu1 %v3511_v0 }
 0x88e   :  { %3178 = vmatpush3.bf16.msra.mxu1 %v3398_v32 }
 0x88f   :  { %3179 = vmatprep.subr.bf16.mxu1 %v3511_v0 }
 0x892   :  { %3180 = vmatpush3.bf16.msra.mxu1 %v3399_v33 }
 0x893   :  { %3205 = vmatprep.subr.bf16.mxu1 %v3511_v0 }
 0x928   :  { %v1637_v3 = vpop.f32.mrb[24].mxu1 }
 0x929   :  { %v1638_v5 = vadd.f32 %v1637_v3, %v1554_v2  ;;  %v3103_v6 = vpop.f32.mrb[25].mxu1 }
 0x92a   :  { %v1640_v7 = vpop.f32.mrb[26].mxu1 }
 0x92b   :  { %v1641_v8 = vadd.f32 %v1640_v7, %v1554_v2  ;;  %v3104_v9 = vpop.f32.mrb[27].mxu1  ;;  %v1644_v10 = vmax.f32 %v1638_v5, 0.0 }
 0x92d   :  { %v1645_v12 = vmax.f32 %v1641_v8, 0.0 }
 0x92f   :  { %v1646_v15 = vpack.c.bf16 %v1645_v12, %v1644_v10 }
 0x931   :  { %3122 = vmatmul.mubr.bf16.vlgmr.msra.gmra.mrb[28].mxu0 %v1646_v15 }
 0x932   :  { %3146 = vmatpush3.bf16.msra.mxu0 %v3384_v13  ;;  %3161 = vmatprep.mubr.msk.bf16.mxu0 %vm3512_vm0, %v3511_v0 }
 0x933   :  { %3147 = vmatprep.subr.bf16.mxu0 %v3511_v0 }
 0x936   :  { %3148 = vmatpush3.bf16.msra.mxu0 %v3385_v16  ;;  %v3414_v16 = vld [vmem:[#allocation4 + $0x4f0] sm:$0xff]  }
 0x937   :  { %3149 = vmatprep.subr.bf16.mxu0 %v3511_v0 }
 0x93a   :  { %3150 = vmatpush3.bf16.msra.mxu0 %v3386_v47  ;;  %v3418_v47 = vld [vmem:[#allocation4 + $0x510] sm:$0xff]  }
 0x93b   :  { %3151 = vmatprep.subr.bf16.mxu0 %v3511_v0 }
 0x93e   :  { %3152 = vmatpush3.bf16.msra.mxu0 %v3387_v17  ;;  %v3419_v17 = vld [vmem:[#allocation4 + $0x518] sm:$0xff]  }
 0x93f   :  { %3153 = vmatprep.subr.bf16.mxu0 %v3511_v0 }
 0x942   :  { %3154 = vmatpush3.bf16.msra.mxu0 %v3388_v18  ;;  %v3420_v18 = vld [vmem:[#allocation4 + $0x520] sm:$0xff]  }
 0x943   :  { %3155 = vmatprep.subr.bf16.mxu0 %v3511_v0 }
 0x946   :  { %3156 = vmatpush3.bf16.msra.mxu0 %v3389_v19  ;;  %v3421_v19 = vld [vmem:[#allocation4 + $0x528] sm:$0xff]  }
 0x947   :  { %3157 = vmatprep.subr.bf16.mxu0 %v3511_v0 }
 0x948   :  { %v1877_v21 = vpop.f32.mrb[28].mxu1 }
 0x949   :  { %v3143_v22 = vpop.f32.mrb[29].mxu1 }
 0x94a   :  { %v1880_v23 = vpop.f32.mrb[30].mxu1  ;;  %3158 = vmatpush3.bf16.msra.mxu0 %v3390_v20  ;;  %v58_v20 = vld [vmem:[#allocation6 + $0x10] sm:$0xff] }
 0x94b   :  { %v3144_v30 = vpop.f32.mrb[31].mxu1  ;;  %3159 = vmatprep.subr.bf16.mxu0 %v3511_v0 }
 0x94e   :  { %3160 = vmatpush3.bf16.msra.mxu0 %v3391_v26 }
 0x94f   :  { %3185 = vmatprep.subr.bf16.mxu0 %v3511_v0 }
 0x951   :  { %3162 = vmatmul.mubr.bf16.vlgmr.msra.gmra.mrb[32].mxu0 %v3692_v24  ;;  %v3403_v24 = vld [vmem:[#allocation4 + $0x498] sm:$0xff]  }
 0x952   :  { %3201 = vmatprep.mubr.msk.bf16.mxu0 %vm3512_vm0, %v3511_v0  ;;  %3186 = vmatpush3.bf16.msra.mxu0 %v3400_v34 }
 0x953   :  { %3187 = vmatprep.subr.bf16.mxu0 %v3511_v0 }
 0x956   :  { %3188 = vmatpush3.bf16.msra.mxu0 %v3401_v35 }
 0x957   :  { %3189 = vmatprep.subr.bf16.mxu0 %v3511_v0 }
 0x95a   :  { %3190 = vmatpush3.bf16.msra.mxu0 %v3402_v36 }
 0x95b   :  { %3191 = vmatprep.subr.bf16.mxu0 %v3511_v0 }
 0x95e   :  { %3192 = vmatpush3.bf16.msra.mxu0 %v3403_v24  ;;  %v3422_v24 = vld [vmem:[#allocation4 + $0x530] sm:$0xff]  }
 0x95f   :  { %3193 = vmatprep.subr.bf16.mxu0 %v3511_v0 }
 0x962   :  { %3194 = vmatpush3.bf16.msra.mxu0 %v3404_v37  ;;  %v3423_v37 = vld [vmem:[#allocation4 + $0x538] sm:$0xff]  }
 0x963   :  { %3195 = vmatprep.subr.bf16.mxu0 %v3511_v0 }
 0x966   :  { %3196 = vmatpush3.bf16.msra.mxu0 %v3405_v25 }
 0x967   :  { %3197 = vmatprep.subr.bf16.mxu0 %v3511_v0 }
 0x96a   :  { %3198 = vmatpush3.bf16.msra.mxu0 %v3406_v57 }
 0x96b   :  { %3199 = vmatprep.subr.bf16.mxu0 %v3511_v0 }
 0x96e   :  { %3200 = vmatpush3.bf16.msra.mxu0 %v3407_v58 }
 0x96f   :  { %3225 = vmatprep.subr.bf16.mxu0 %v3511_v0 }
 0xa04   :  { %v1750_v39 = vpop.f32.mrb[28].mxu0 }
 0xa05   :  { %v1751_v40 = vadd.f32 %v1750_v39, %v1667_v38  ;;  %v3123_v41 = vpop.f32.mrb[29].mxu0 }
 0xa06   :  { %v1753_v42 = vpop.f32.mrb[30].mxu0 }
 0xa07   :  { %v1754_v43 = vadd.f32 %v1753_v42, %v1667_v38  ;;  %v3124_v44 = vpop.f32.mrb[31].mxu0  ;;  %v1757_v45 = vmax.f32 %v1751_v40, 0.0  ;;  %v2224_v38 = vrot.slane %v58_v20, %v3619_v48 }
 0xa09   :  { %v1758_v46 = vmax.f32 %v1754_v43, 0.0 }
 0xa0b   :  { %v1973_v49 = vpack.c.bf16 %v1758_v46, %v1757_v45 }
 0xa0d   :  { %3182 = vmatmul.mubr.bf16.vlgmr.msra.gmra.mrb[32].mxu1 %v1973_v49  ;;  %v2337_v49 = vrot.slane %v58_v20, %v3634_v4 }
 0xa0e   :  { %3221 = vmatprep.mubr.msk.bf16.mxu1 %vm3512_vm0, %v3511_v0  ;;  %3206 = vmatpush3.bf16.msra.mxu1 %v3408_v59  ;;  %v2442_v59 = vrot.slane %v58_v20, %v3688_v14 }
 0xa0f   :  { %3207 = vmatprep.subr.bf16.mxu1 %v3511_v0 }
 0xa12   :  { %3208 = vmatpush3.bf16.msra.mxu1 %v3409_v60 }
 0xa13   :  { %3209 = vmatprep.subr.bf16.mxu1 %v3511_v0 }
 0xa16   :  { %3210 = vmatpush3.bf16.msra.mxu1 %v3410_v61 }
 0xa17   :  { %3211 = vmatprep.subr.bf16.mxu1 %v3511_v0 }
 0xa1a   :  { %3212 = vmatpush3.bf16.msra.mxu1 %v3411_v62 }
 0xa1b   :  { %3213 = vmatprep.subr.bf16.mxu1 %v3511_v0 }
 0xa1e   :  { %3214 = vmatpush3.bf16.msra.mxu1 %v3412_v29 }
 0xa1f   :  { %3215 = vmatprep.subr.bf16.mxu1 %v3511_v0 }
 0xa22   :  { %3216 = vmatpush3.bf16.msra.mxu1 %v3413_v63 }
 0xa23   :  { %3217 = vmatprep.subr.bf16.mxu1 %v3511_v0 }
 0xa24   :  { %v1966_v51 = vpop.f32.mrb[32].mxu0 }
 0xa25   :  { %v1967_v52 = vadd.f32 %v1966_v51, %v1877_v21  ;;  %v3163_v53 = vpop.f32.mrb[33].mxu0  ;;  %v2111_v21 = vrot.slane %v58_v20, %v3602_v28 }
 0xa26   :  { %v1969_v54 = vpop.f32.mrb[34].mxu0  ;;  %3218 = vmatpush3.bf16.msra.mxu1 %v3414_v16 }
 0xa27   :  { %v1970_v55 = vadd.f32 %v1969_v54, %v1880_v23  ;;  %v3164_v56 = vpop.f32.mrb[35].mxu0  ;;  %3219 = vmatprep.subr.bf16.mxu1 %v3511_v0 }
 0xa2a   :  { %3220 = vmatpush3.bf16.msra.mxu1 %v3415_v27 }
 0xae0   :  { %v2073_v2 = vpop.f32.mrb[32].mxu1 }
 0xae1   :  { %v2080_v3 = vadd.f32 %v2073_v2, %v1967_v52  ;;  %v3183_v5 = vpop.f32.mrb[33].mxu1 }
 0xae2   :  { %v2076_v6 = vpop.f32.mrb[34].mxu1 }
 0xae3   :  { %v2086_v7 = vadd.f32 %v2085_v1, %v2080_v3  ;;  %v2081_v8 = vadd.f32 %v2076_v6, %v1970_v55  ;;  %v3184_v9 = vpop.f32.mrb[35].mxu1 }
 0xae5   :  { %v2087_v10 = vadd.f32 %v2085_v1, %v2081_v8  ;;  %v2088_v12 = vmax.f32 %v2086_v7, 0.0 }
 0xae7   :  { %v2089_v13 = vmax.f32 %v2087_v10, 0.0 }
 0xae9   :  { %v2090_v15 = vpack.c.bf16 %v2089_v13, %v2088_v12 }
 0xaeb   :  { %3202 = vmatmul.mubr.bf16.vlgmr.msra.gmra.mrb[36].mxu0 %v2090_v15 }
 0xaec   :  { %3241 = vmatprep.mubr.msk.bf16.mxu0 %vm3512_vm0, %v3511_v0  ;;  %3226 = vmatpush3.bf16.msra.mxu0 %v3416_v50 }
 0xaed   :  { %3227 = vmatprep.subr.bf16.mxu0 %v3511_v0 }
 0xaf0   :  { %3228 = vmatpush3.bf16.msra.mxu0 %v3417_v11 }
 0xaf1   :  { %3229 = vmatprep.subr.bf16.mxu0 %v3511_v0 }
 0xaf4   :  { %3230 = vmatpush3.bf16.msra.mxu0 %v3418_v47 }
 0xaf5   :  { %3231 = vmatprep.subr.bf16.mxu0 %v3511_v0 }
 0xaf8   :  { %3232 = vmatpush3.bf16.msra.mxu0 %v3419_v17 }
 0xaf9   :  { %3233 = vmatprep.subr.bf16.mxu0 %v3511_v0 }
 0xafc   :  { %3234 = vmatpush3.bf16.msra.mxu0 %v3420_v18 }
 0xafd   :  { %3235 = vmatprep.subr.bf16.mxu0 %v3511_v0 }
 0xb00   :  { %3236 = vmatpush3.bf16.msra.mxu0 %v3421_v19 }
 0xb01   :  { %3237 = vmatprep.subr.bf16.mxu0 %v3511_v0 }
 0xb04   :  { %3238 = vmatpush3.bf16.msra.mxu0 %v3422_v24 }
 0xb05   :  { %3239 = vmatprep.subr.bf16.mxu0 %v3511_v0  ;;  %v2432_v0 = vrot.slane %v58_v20, %v3653_v31 }
 0xb08   :  { %3240 = vmatpush3.bf16.msra.mxu0 %v3423_v37 }
 0xbbe   :  { %v2194_v22 = vpop.f32.mrb[36].mxu0 }
 0xbbf   :  { %v2195_v23 = vadd.f32 %v2194_v22, %v2111_v21  ;;  %v3203_v26 = vpop.f32.mrb[37].mxu0 }
 0xbc0   :  { %v2197_v30 = vpop.f32.mrb[38].mxu0 }
 0xbc1   :  { %v2198_v32 = vadd.f32 %v2197_v30, %v2111_v21  ;;  %v3204_v33 = vpop.f32.mrb[39].mxu0  ;;  %v2201_v34 = vmax.f32 %v2195_v23, 0.0 }
 0xbc3   :  { %v2202_v35 = vmax.f32 %v2198_v32, 0.0 }
 0xbc5   :  { %v2203_v36 = vpack.c.bf16 %v2202_v35, %v2201_v34 }
 0xbc7   :  { %3222 = vmatmul.mubr.bf16.vlgmr.msra.gmra.mrb[36].mxu1 %v2203_v36 }
 0xc9a   :  { %v2307_v39 = vpop.f32.mrb[36].mxu1 }
 0xc9b   :  { %v2308_v28 = vadd.f32 %v2307_v39, %v2224_v38  ;;  %v3223_v40 = vpop.f32.mrb[37].mxu1 }
 0xc9c   :  { %v2310_v41 = vpop.f32.mrb[38].mxu1 }
 0xc9d   :  { %v2311_v42 = vadd.f32 %v2310_v41, %v2224_v38  ;;  %v3224_v43 = vpop.f32.mrb[39].mxu1  ;;  %v2314_v44 = vmax.f32 %v2308_v28, 0.0 }
 0xc9f   :  { %v2315_v45 = vmax.f32 %v2311_v42, 0.0 }
 0xca1   :  { %v2316_v46 = vpack.c.bf16 %v2315_v45, %v2314_v44 }
 0xca3   :  { %3242 = vmatmul.mubr.bf16.vlgmr.msra.gmra.mrb[40].mxu0 %v2316_v46 }
 0xd76   :  { %v2420_v51 = vpop.f32.mrb[40].mxu0 }
 0xd77   :  { %v2421_v52 = vadd.f32 %v2420_v51, %v2337_v49  ;;  %v3243_v53 = vpop.f32.mrb[41].mxu0 }
 0xd78   :  { %v2423_v54 = vpop.f32.mrb[42].mxu0 }
 0xd79   :  { %v2427_v55 = vmax.f32 %v2421_v52, 0.0  ;;  %v2424_v48 = vadd.f32 %v2423_v54, %v2337_v49  ;;  %v3244_v56 = vpop.f32.mrb[43].mxu0 }
 0xd7b   :  { %v2428_v25 = vmax.f32 %v2424_v48, 0.0  ;;  %v2433_v57 = vmul.f32 %v2432_v0, %v2427_v55 }
 0xd7d   :  { %2435 = vadd.xlane.f32.xlu0 %v2433_v57  ;;  %v2434_v58 = vmul.f32 %v2432_v0, %v2428_v25 }
 0xd81   :  { %2437 = vadd.xlane.f32.xlu0 %v2434_v58 }
 0xe0a   :  { %v2436_v60 = vpop.xlane.xlu0 %2435 }
 0xe0b   :  { %v2443_v61 = vadd.f32 %v2442_v59, %v2436_v60 }
 0xe0d   :  { %v2634_v62 = vmul.f32 -1.442695, %v2443_v61 }
 0xe0e   :  { %v2438_v4 = vpop.xlane.xlu0 %2437 }
 0xe0f   :  { %3424 = vpow2.f32 %v2634_v62  ;;  %v2444_v29 = vadd.f32 %v2442_v59, %v2438_v4 }
 0xe11   :  { %v2635_v63 = vmul.f32 -1.442695, %v2444_v29 }
 0xe13   :  { %3426 = vpow2.f32 %v2635_v63 }
 0xe19   :  { %v3425_v31 = vpop.eup %3424 }
 0xe1a   :  { %v2451_v1 = vadd.f32 1.0, %v3425_v31 }
 0xe1c   :  { %3428 = vrcp.f32 %v2451_v1 }
 0xe1d   :  { %v3427_v2 = vpop.eup %3426 }
 0xe1e   :  { %v2452_v3 = vadd.f32 1.0, %v3427_v2 }
 0xe20   :  { %3430 = vrcp.f32 %v2452_v3 }
 0xe26   :  { %v3429_v5 = vpop.eup %3428 }
 0xe27   :  { %2458 = vst.msk [vmem:[%s3861_s3] sm:$0xff] %vm2457_vm1, %v3429_v5 }
 0xe2a   :  { %v3431_v14 = vpop.eup %3430 }
 0xe2b   :  { %2459 = vst.msk [vmem:[%s3861_s3 + $0x8] sm:$0xff] %vm2457_vm1, %v3431_v14 }
 0xe2c   :  { %2464 = vsyncpa [#allocation3], 1 }
 0xe2d   :  { %2465 = vsyncpa [#allocation5], 1 }

</bundles_post_ra>
